<compile_context>
chip_gen: v5e
topology: v5e:2x2
jax: 0.10.0
libtpu: 0.0.40
codegen_flags: <defaults>
</compile_context>

<pallas_src>
import functools
import math

import jax
import jax.numpy as jnp
from jax import lax
from jax.experimental import pallas as pl
from jax.experimental.pallas import tpu as pltpu


def _fused_head_kernel(*refs, pools):
    """Pool every pathway block and store it channels-last (lane-dense).

    refs = (x_ref_0, ..., x_ref_{P-1}, o_ref_0, ..., o_ref_{P-1})
      x_ref_p : (C_p/G, T_p, H, W)   pathway-p channel block, native NCTHW layout
      o_ref_p : (To, Ho, Wo, C_p/G)  pathway-p pooled block, channels-last
    """
    P = len(pools)
    x_refs, o_refs = refs[:P], refs[P:]

    for p in range(P):
        kT, kH, kW = pools[p]
        x_ref, o_ref = x_refs[p], o_refs[p]
        To, Ho, Wo, _cb = o_ref.shape
        inv = 1.0 / float(kT * kH * kW)

        # ---- T pass first (largest shrink; pure major-dim address offsets).
        #      The f32 cast is folded into the shifted loads so the full f32
        #      copy of the (cb, T, H, W) block is never materialized.
        acc = x_ref[:, 0:To].astype(jnp.float32)              # (cb, To, H, W)
        for dt in range(1, kT):
            acc = acc + x_ref[:, dt:dt + To].astype(jnp.float32)

        # ---- H pass (sublane shifts on the already T-reduced block).
        acch = acc[:, :, 0:Ho, :]                              # (cb, To, Ho, W)
        for dh in range(1, kH):
            acch = acch + acc[:, :, dh:dh + Ho, :]

        # ---- W pass (lane shifts).
        accw = acch[..., 0:Wo]                                 # (cb, To, Ho, Wo)
        for dw in range(1, kW):
            accw = accw + acch[..., dw:dw + Wo]

        pooled = accw * inv                                    # (cb, To, Ho, Wo) f32

        # ---- Channels-last, lane-dense store.
        # (cb, To, Ho, Wo) -> (To, Ho, Wo, cb) decomposed into per-(to, ho)
        # 2-D transposes (the last-two-dims swap the TPU backend handles
        # natively); the XLU slot is otherwise idle in this kernel.
        for to in range(To):
            for ho in range(Ho):
                slab = pooled[:, to, ho, :]                    # (cb, Wo)
                o_ref[to, ho, :, :] = jnp.transpose(slab).astype(o_ref.dtype)


def modified_video_slowfast_head(inputs_ncthw, pool_size, dropout_rate=0.0):
    """Forward pass of ModifiedVideoSlowFastHead.

    Args:
      inputs_ncthw: list of p arrays, each (N, C_p, T_p, H, W) (PyTorch layout).
      pool_size:    list of p (kT, kH, kW) pooling kernel sizes (stride 1).
      dropout_rate: must be 0.0 (the module only adds Dropout when rate > 0).

    Returns:
      (N, T', H', W', sum(C_p)) array == torch.cat(dim=1) + permute((0,2,3,4,1)).
    """
    assert len(inputs_ncthw) == len(pool_size), "pathway dimensions are not consistent."
    # TODO(synk): training-time Dropout (rate > 0) not implemented in-kernel.
    assert dropout_rate == 0.0

    P = len(inputs_ncthw)
    N = int(inputs_ncthw[0].shape[0])
    dtype = inputs_ncthw[0].dtype
    assert all(x.dtype == dtype for x in inputs_ncthw)
    itemsize = jnp.dtype(dtype).itemsize
    sub = max(8, 32 // itemsize)  # sublane packing: 8 (f32) / 16 (bf16) / 32 (int8)

    pools = [tuple(int(k) for k in p) for p in pool_size]
    Cs, out_dims_list = [], []
    for x, (kT, kH, kW) in zip(inputs_ncthw, pools):
        n, c, t, h, w = (int(s) for s in x.shape)
        assert n == N
        Cs.append(c)
        out_dims_list.append((t - kT + 1, h - kH + 1, w - kW + 1))
    To, Ho, Wo = out_dims_list[0]
    assert all(d == (To, Ho, Wo) for d in out_dims_list), \
        "pooled spatio-temporal shapes must match for the channel concat"
    assert To >= 1 and Ho >= 1 and Wo >= 1, "pool size larger than input"

    # ---- Generation-aware VMEM budget (v5e/v6e: 128 MiB; v7x: 64 MiB). ----
    try:
        vmem_cap = int(pltpu.get_tpu_info().vmem_capacity_bytes)
    except Exception:
        vmem_cap = 64 * 1024 * 1024  # conservative fallback (v7x-sized)
    vmem_limit = min((vmem_cap * 3) // 4, 100 * 1024 * 1024)  # ~96-100 MiB v5e/v6e, ~48 MiB v7x
    block_budget = (vmem_limit * 7) // 10                     # headroom for compiler scratch

    def _rnd(v, m):
        return ((v + m - 1) // m) * m

    def _block_bytes(G):
        total = 0
        for x, c in zip(inputs_ncthw, Cs):
            _, _, t, h, w = (int(s) for s in x.shape)
            cb = c // G
            # double-buffered input block (native dtype, dtype-aware padding)
            total += 2 * cb * t * _rnd(h, sub) * _rnd(w, 128) * itemsize
            # double-buffered channels-last output block (lane dim = cb)
            total += 2 * To * Ho * _rnd(Wo, sub) * _rnd(cb, 128) * itemsize
            # peak f32 compute temporaries (T-pass + H-pass accumulators)
            total += 2 * cb * To * _rnd(h, 8) * _rnd(w, 128) * 4
        return total

    # Channel split G: must divide every C_p; each block C_p/G becomes the
    # output lane dim, so it must be a multiple of 128 unless G == 1.
    g_all = Cs[0]
    for c in Cs[1:]:
        g_all = math.gcd(g_all, c)
    valid = [d for d in range(1, g_all + 1)
             if g_all % d == 0 and (d == 1 or all((c // d) % 128 == 0 for c in Cs))]
    G = next((d for d in sorted(valid) if _block_bytes(d) <= block_budget), max(valid))
    c_blocks = [c // G for c in Cs]

    in_specs = [
        pl.BlockSpec(
            (None, c_blocks[p]) + tuple(int(s) for s in inputs_ncthw[p].shape[2:]),
            lambda n, g: (n, g, 0, 0, 0))
        for p in range(P)
    ]
    out_specs = [
        pl.BlockSpec((None, To, Ho, Wo, c_blocks[p]), lambda n, g: (n, 0, 0, 0, g))
        for p in range(P)
    ]
    out_shape = tuple(
        jax.ShapeDtypeStruct((N, To, Ho, Wo, Cs[p]), dtype) for p in range(P))

    kernel = functools.partial(_fused_head_kernel, pools=tuple(pools))

    pooled = pl.pallas_call(
        kernel,
        out_shape=out_shape,
        grid=(N, G),
        in_specs=in_specs,
        out_specs=out_specs,
        compiler_params=pltpu.CompilerParams(
            # Every grid step owns disjoint blocks of every output, so both
            # axes are parallel (v7x megacore sharding even at small batch).
            dimension_semantics=("parallel", "parallel"),
            vmem_limit_bytes=int(vmem_limit),
        ),
    )(*inputs_ncthw)

    # torch.cat(dim=1) + permute((0,2,3,4,1)) == lane-dense concat of the
    # already channels-last per-pathway pooled outputs (no transpose pass).
    return pooled[0] if P == 1 else jnp.concatenate(list(pooled), axis=-1)


def _reference(inputs_ncthw, pool_size):
    """Plain-JAX reference using lax.reduce_window (mirrors nn.AvgPool3d)."""
    pooled = []
    for x, (kT, kH, kW) in zip(inputs_ncthw, pool_size):
        s = lax.reduce_window(
            x.astype(jnp.float32),
            0.0,
            lax.add,
            window_dimensions=(1, 1, kT, kH, kW),
            window_strides=(1, 1, 1, 1, 1),
            padding="VALID",
        )
        pooled.append((s / float(kT * kH * kW)).astype(x.dtype))
    y = jnp.concatenate(pooled, axis=1)
    return jnp.transpose(y, (0, 2, 3, 4, 1))


if __name__ == "__main__":
    key = jax.random.PRNGKey(0)
    k0, k1 = jax.random.split(key)

    # Two pathways (slow / fast style): different channel + temporal dims,
    # pool sizes chosen so the pooled spatio-temporal shapes match for concat.
    # pathway 0: N=2, C=4, T=4, H=8, W=8, pool=(2,2,2) -> pooled (2, 3, 7, 7, 4)
    # pathway 1: N=2, C=8, T=8, H=8, W=8, pool=(6,2,2) -> pooled (2, 3, 7, 7, 8)
    x0 = jax.random.normal(k0, (2, 4, 4, 8, 8), dtype=jnp.float32)
    x1 = jax.random.normal(k1, (2, 8, 8, 8, 8), dtype=jnp.float32)
    pool_size = [(2, 2, 2), (6, 2, 2)]

    out = modified_video_slowfast_head([x0, x1], pool_size, dropout_rate=0.0)
    out = jax.block_until_ready(out)

    ref = _reference([x0, x1], pool_size)
    assert out.shape == (2, 3, 7, 7, 12), out.shape
    assert jnp.allclose(out, ref, atol=1e-5, rtol=1e-5), "mismatch vs reference"

    # Single-pathway path (no concat needed at all).
    out1 = jax.block_until_ready(
        modified_video_slowfast_head([x0], [pool_size[0]], dropout_rate=0.0))
    ref1 = _reference([x0], [pool_size[0]])
    assert out1.shape == (2, 3, 7, 7, 4), out1.shape
    assert jnp.allclose(out1, ref1, atol=1e-5, rtol=1e-5), "mismatch vs reference (P=1)"

    print("KERNEL_OK")
</pallas_src>

<mosaic_0001>
module attributes {stable_mosaic.version = 11 : i64} {
  func.func @_fused_head_kernel(%arg0: i32, %arg1: i32, %arg2: memref<1x4x4x8x8xf32, #tpu.memory_space<vmem>>, %arg3: memref<1x8x8x8x8xf32, #tpu.memory_space<vmem>>, %arg4: memref<1x3x7x7x4xf32, #tpu.memory_space<vmem>>, %arg5: memref<1x3x7x7x8xf32, #tpu.memory_space<vmem>>) attributes {dimension_semantics = [#tpu.dimension_semantics<parallel>, #tpu.dimension_semantics<parallel>], iteration_bounds = array<i64: 2, 1>, scalar_prefetch = 0 : i64, scratch_operands = 0 : i64, tpu.core_type = #tpu.core_type<tc>, window_params = [{transform_indices = @transform_0, window_bounds = array<i64: 1, 4, 4, 8, 8>}, {transform_indices = @transform_1, window_bounds = array<i64: 1, 8, 8, 8, 8>}, {transform_indices = @transform_2, window_bounds = array<i64: 1, 3, 7, 7, 4>}, {transform_indices = @transform_3, window_bounds = array<i64: 1, 3, 7, 7, 8>}]} {
    %c0 = arith.constant 0 : index
    %c0_0 = arith.constant 0 : index
    %c0_1 = arith.constant 0 : index
    %c0_2 = arith.constant 0 : index
    %c0_3 = arith.constant 0 : index
    %0 = vector.load %arg2[%c0, %c0_0, %c0_1, %c0_2, %c0_3] : memref<1x4x4x8x8xf32, #tpu.memory_space<vmem>>, vector<1x4x3x8x8xf32>
    %1 = vector.shape_cast %0 : vector<1x4x3x8x8xf32> to vector<4x3x8x8xf32>
    %c0_4 = arith.constant 0 : index
    %c0_5 = arith.constant 0 : index
    %c1 = arith.constant 1 : index
    %c0_6 = arith.constant 0 : index
    %c0_7 = arith.constant 0 : index
    %2 = vector.load %arg2[%c0_4, %c0_5, %c1, %c0_6, %c0_7] : memref<1x4x4x8x8xf32, #tpu.memory_space<vmem>>, vector<1x4x3x8x8xf32>
    %3 = vector.shape_cast %2 : vector<1x4x3x8x8xf32> to vector<4x3x8x8xf32>
    %4 = arith.addf %1, %3 : vector<4x3x8x8xf32>
    %5 = vector.extract_strided_slice %4 {offsets = [0, 0, 0, 0], sizes = [4, 3, 7, 8], strides = [1, 1, 1, 1]} : vector<4x3x8x8xf32> to vector<4x3x7x8xf32>
    %6 = vector.extract_strided_slice %4 {offsets = [0, 0, 1, 0], sizes = [4, 3, 7, 8], strides = [1, 1, 1, 1]} : vector<4x3x8x8xf32> to vector<4x3x7x8xf32>
    %7 = arith.addf %5, %6 : vector<4x3x7x8xf32>
    %8 = vector.extract_strided_slice %7 {offsets = [0, 0, 0, 0], sizes = [4, 3, 7, 7], strides = [1, 1, 1, 1]} : vector<4x3x7x8xf32> to vector<4x3x7x7xf32>
    %9 = vector.extract_strided_slice %7 {offsets = [0, 0, 0, 1], sizes = [4, 3, 7, 7], strides = [1, 1, 1, 1]} : vector<4x3x7x8xf32> to vector<4x3x7x7xf32>
    %10 = arith.addf %8, %9 : vector<4x3x7x7xf32>
    %cst = arith.constant 1.250000e-01 : f32
    %11 = vector.broadcast %cst : f32 to vector<4x3x7x7xf32>
    %12 = arith.mulf %10, %11 : vector<4x3x7x7xf32>
    %13 = vector.extract_strided_slice %12 {offsets = [0, 0, 0, 0], sizes = [4, 1, 1, 7], strides = [1, 1, 1, 1]} : vector<4x3x7x7xf32> to vector<4x1x1x7xf32>
    %14 = vector.shape_cast %13 : vector<4x1x1x7xf32> to vector<4x7xf32>
    %15 = tpu.transpose %14, [1, 0] : vector<4x7xf32> -> vector<7x4xf32>
    %c0_8 = arith.constant 0 : index
    %c0_9 = arith.constant 0 : index
    %c0_10 = arith.constant 0 : index
    %c0_11 = arith.constant 0 : index
    %c0_12 = arith.constant 0 : index
    %16 = vector.load %arg4[%c0_8, %c0_9, %c0_10, %c0_11, %c0_12] : memref<1x3x7x7x4xf32, #tpu.memory_space<vmem>>, vector<1x1x1x7x4xf32>
    %17 = vector.shape_cast %16 : vector<1x1x1x7x4xf32> to vector<7x4xf32>
    %18 = vector.shape_cast %15 : vector<7x4xf32> to vector<1x1x1x7x4xf32>
    tpu.vector_store %arg4[%c0_8, %c0_9, %c0_10, %c0_11, %c0_12], %18 {strides = array<i32>} : memref<1x3x7x7x4xf32, #tpu.memory_space<vmem>>, vector<1x1x1x7x4xf32>,
    %19 = vector.extract_strided_slice %12 {offsets = [0, 0, 1, 0], sizes = [4, 1, 1, 7], strides = [1, 1, 1, 1]} : vector<4x3x7x7xf32> to vector<4x1x1x7xf32>
    %20 = vector.shape_cast %19 : vector<4x1x1x7xf32> to vector<4x7xf32>
    %21 = tpu.transpose %20, [1, 0] : vector<4x7xf32> -> vector<7x4xf32>
    %c0_13 = arith.constant 0 : index
    %c0_14 = arith.constant 0 : index
    %c1_15 = arith.constant 1 : index
    %c0_16 = arith.constant 0 : index
    %c0_17 = arith.constant 0 : index
    %22 = vector.load %arg4[%c0_13, %c0_14, %c1_15, %c0_16, %c0_17] : memref<1x3x7x7x4xf32, #tpu.memory_space<vmem>>, vector<1x1x1x7x4xf32>
    %23 = vector.shape_cast %22 : vector<1x1x1x7x4xf32> to vector<7x4xf32>
    %24 = vector.shape_cast %21 : vector<7x4xf32> to vector<1x1x1x7x4xf32>
    tpu.vector_store %arg4[%c0_13, %c0_14, %c1_15, %c0_16, %c0_17], %24 {strides = array<i32>} : memref<1x3x7x7x4xf32, #tpu.memory_space<vmem>>, vector<1x1x1x7x4xf32>,
    %25 = vector.extract_strided_slice %12 {offsets = [0, 0, 2, 0], sizes = [4, 1, 1, 7], strides = [1, 1, 1, 1]} : vector<4x3x7x7xf32> to vector<4x1x1x7xf32>
    %26 = vector.shape_cast %25 : vector<4x1x1x7xf32> to vector<4x7xf32>
    %27 = tpu.transpose %26, [1, 0] : vector<4x7xf32> -> vector<7x4xf32>
    %c0_18 = arith.constant 0 : index
    %c0_19 = arith.constant 0 : index
    %c2 = arith.constant 2 : index
    %c0_20 = arith.constant 0 : index
    %c0_21 = arith.constant 0 : index
    %28 = vector.load %arg4[%c0_18, %c0_19, %c2, %c0_20, %c0_21] : memref<1x3x7x7x4xf32, #tpu.memory_space<vmem>>, vector<1x1x1x7x4xf32>
    %29 = vector.shape_cast %28 : vector<1x1x1x7x4xf32> to vector<7x4xf32>
    %30 = vector.shape_cast %27 : vector<7x4xf32> to vector<1x1x1x7x4xf32>
    tpu.vector_store %arg4[%c0_18, %c0_19, %c2, %c0_20, %c0_21], %30 {strides = array<i32>} : memref<1x3x7x7x4xf32, #tpu.memory_space<vmem>>, vector<1x1x1x7x4xf32>,
    %31 = vector.extract_strided_slice %12 {offsets = [0, 0, 3, 0], sizes = [4, 1, 1, 7], strides = [1, 1, 1, 1]} : vector<4x3x7x7xf32> to vector<4x1x1x7xf32>
    %32 = vector.shape_cast %31 : vector<4x1x1x7xf32> to vector<4x7xf32>
    %33 = tpu.transpose %32, [1, 0] : vector<4x7xf32> -> vector<7x4xf32>
    %c0_22 = arith.constant 0 : index
    %c0_23 = arith.constant 0 : index
    %c3 = arith.constant 3 : index
    %c0_24 = arith.constant 0 : index
    %c0_25 = arith.constant 0 : index
    %34 = vector.load %arg4[%c0_22, %c0_23, %c3, %c0_24, %c0_25] : memref<1x3x7x7x4xf32, #tpu.memory_space<vmem>>, vector<1x1x1x7x4xf32>
    %35 = vector.shape_cast %34 : vector<1x1x1x7x4xf32> to vector<7x4xf32>
    %36 = vector.shape_cast %33 : vector<7x4xf32> to vector<1x1x1x7x4xf32>
    tpu.vector_store %arg4[%c0_22, %c0_23, %c3, %c0_24, %c0_25], %36 {strides = array<i32>} : memref<1x3x7x7x4xf32, #tpu.memory_space<vmem>>, vector<1x1x1x7x4xf32>,
    %37 = vector.extract_strided_slice %12 {offsets = [0, 0, 4, 0], sizes = [4, 1, 1, 7], strides = [1, 1, 1, 1]} : vector<4x3x7x7xf32> to vector<4x1x1x7xf32>
    %38 = vector.shape_cast %37 : vector<4x1x1x7xf32> to vector<4x7xf32>
    %39 = tpu.transpose %38, [1, 0] : vector<4x7xf32> -> vector<7x4xf32>
    %c0_26 = arith.constant 0 : index
    %c0_27 = arith.constant 0 : index
    %c4 = arith.constant 4 : index
    %c0_28 = arith.constant 0 : index
    %c0_29 = arith.constant 0 : index
    %40 = vector.load %arg4[%c0_26, %c0_27, %c4, %c0_28, %c0_29] : memref<1x3x7x7x4xf32, #tpu.memory_space<vmem>>, vector<1x1x1x7x4xf32>
    %41 = vector.shape_cast %40 : vector<1x1x1x7x4xf32> to vector<7x4xf32>
    %42 = vector.shape_cast %39 : vector<7x4xf32> to vector<1x1x1x7x4xf32>
    tpu.vector_store %arg4[%c0_26, %c0_27, %c4, %c0_28, %c0_29], %42 {strides = array<i32>} : memref<1x3x7x7x4xf32, #tpu.memory_space<vmem>>, vector<1x1x1x7x4xf32>,
    %43 = vector.extract_strided_slice %12 {offsets = [0, 0, 5, 0], sizes = [4, 1, 1, 7], strides = [1, 1, 1, 1]} : vector<4x3x7x7xf32> to vector<4x1x1x7xf32>
    %44 = vector.shape_cast %43 : vector<4x1x1x7xf32> to vector<4x7xf32>
    %45 = tpu.transpose %44, [1, 0] : vector<4x7xf32> -> vector<7x4xf32>
    %c0_30 = arith.constant 0 : index
    %c0_31 = arith.constant 0 : index
    %c5 = arith.constant 5 : index
    %c0_32 = arith.constant 0 : index
    %c0_33 = arith.constant 0 : index
    %46 = vector.load %arg4[%c0_30, %c0_31, %c5, %c0_32, %c0_33] : memref<1x3x7x7x4xf32, #tpu.memory_space<vmem>>, vector<1x1x1x7x4xf32>
    %47 = vector.shape_cast %46 : vector<1x1x1x7x4xf32> to vector<7x4xf32>
    %48 = vector.shape_cast %45 : vector<7x4xf32> to vector<1x1x1x7x4xf32>
    tpu.vector_store %arg4[%c0_30, %c0_31, %c5, %c0_32, %c0_33], %48 {strides = array<i32>} : memref<1x3x7x7x4xf32, #tpu.memory_space<vmem>>, vector<1x1x1x7x4xf32>,
    %49 = vector.extract_strided_slice %12 {offsets = [0, 0, 6, 0], sizes = [4, 1, 1, 7], strides = [1, 1, 1, 1]} : vector<4x3x7x7xf32> to vector<4x1x1x7xf32>
    %50 = vector.shape_cast %49 : vector<4x1x1x7xf32> to vector<4x7xf32>
    %51 = tpu.transpose %50, [1, 0] : vector<4x7xf32> -> vector<7x4xf32>
    %c0_34 = arith.constant 0 : index
    %c0_35 = arith.constant 0 : index
    %c6 = arith.constant 6 : index
    %c0_36 = arith.constant 0 : index
    %c0_37 = arith.constant 0 : index
    %52 = vector.load %arg4[%c0_34, %c0_35, %c6, %c0_36, %c0_37] : memref<1x3x7x7x4xf32, #tpu.memory_space<vmem>>, vector<1x1x1x7x4xf32>
    %53 = vector.shape_cast %52 : vector<1x1x1x7x4xf32> to vector<7x4xf32>
    %54 = vector.shape_cast %51 : vector<7x4xf32> to vector<1x1x1x7x4xf32>
    tpu.vector_store %arg4[%c0_34, %c0_35, %c6, %c0_36, %c0_37], %54 {strides = array<i32>} : memref<1x3x7x7x4xf32, #tpu.memory_space<vmem>>, vector<1x1x1x7x4xf32>,
    %55 = vector.extract_strided_slice %12 {offsets = [0, 1, 0, 0], sizes = [4, 1, 1, 7], strides = [1, 1, 1, 1]} : vector<4x3x7x7xf32> to vector<4x1x1x7xf32>
    %56 = vector.shape_cast %55 : vector<4x1x1x7xf32> to vector<4x7xf32>
    %57 = tpu.transpose %56, [1, 0] : vector<4x7xf32> -> vector<7x4xf32>
    %c0_38 = arith.constant 0 : index
    %c1_39 = arith.constant 1 : index
    %c0_40 = arith.constant 0 : index
    %c0_41 = arith.constant 0 : index
    %c0_42 = arith.constant 0 : index
    %58 = vector.load %arg4[%c0_38, %c1_39, %c0_40, %c0_41, %c0_42] : memref<1x3x7x7x4xf32, #tpu.memory_space<vmem>>, vector<1x1x1x7x4xf32>
    %59 = vector.shape_cast %58 : vector<1x1x1x7x4xf32> to vector<7x4xf32>
    %60 = vector.shape_cast %57 : vector<7x4xf32> to vector<1x1x1x7x4xf32>
    tpu.vector_store %arg4[%c0_38, %c1_39, %c0_40, %c0_41, %c0_42], %60 {strides = array<i32>} : memref<1x3x7x7x4xf32, #tpu.memory_space<vmem>>, vector<1x1x1x7x4xf32>,
    %61 = vector.extract_strided_slice %12 {offsets = [0, 1, 1, 0], sizes = [4, 1, 1, 7], strides = [1, 1, 1, 1]} : vector<4x3x7x7xf32> to vector<4x1x1x7xf32>
    %62 = vector.shape_cast %61 : vector<4x1x1x7xf32> to vector<4x7xf32>
    %63 = tpu.transpose %62, [1, 0] : vector<4x7xf32> -> vector<7x4xf32>
    %c0_43 = arith.constant 0 : index
    %c1_44 = arith.constant 1 : index
    %c1_45 = arith.constant 1 : index
    %c0_46 = arith.constant 0 : index
    %c0_47 = arith.constant 0 : index
    %64 = vector.load %arg4[%c0_43, %c1_44, %c1_45, %c0_46, %c0_47] : memref<1x3x7x7x4xf32, #tpu.memory_space<vmem>>, vector<1x1x1x7x4xf32>
    %65 = vector.shape_cast %64 : vector<1x1x1x7x4xf32> to vector<7x4xf32>
    %66 = vector.shape_cast %63 : vector<7x4xf32> to vector<1x1x1x7x4xf32>
    tpu.vector_store %arg4[%c0_43, %c1_44, %c1_45, %c0_46, %c0_47], %66 {strides = array<i32>} : memref<1x3x7x7x4xf32, #tpu.memory_space<vmem>>, vector<1x1x1x7x4xf32>,
    %67 = vector.extract_strided_slice %12 {offsets = [0, 1, 2, 0], sizes = [4, 1, 1, 7], strides = [1, 1, 1, 1]} : vector<4x3x7x7xf32> to vector<4x1x1x7xf32>
    %68 = vector.shape_cast %67 : vector<4x1x1x7xf32> to vector<4x7xf32>
    %69 = tpu.transpose %68, [1, 0] : vector<4x7xf32> -> vector<7x4xf32>
    %c0_48 = arith.constant 0 : index
    %c1_49 = arith.constant 1 : index
    %c2_50 = arith.constant 2 : index
    %c0_51 = arith.constant 0 : index
    %c0_52 = arith.constant 0 : index
    %70 = vector.load %arg4[%c0_48, %c1_49, %c2_50, %c0_51, %c0_52] : memref<1x3x7x7x4xf32, #tpu.memory_space<vmem>>, vector<1x1x1x7x4xf32>
    %71 = vector.shape_cast %70 : vector<1x1x1x7x4xf32> to vector<7x4xf32>
    %72 = vector.shape_cast %69 : vector<7x4xf32> to vector<1x1x1x7x4xf32>
    tpu.vector_store %arg4[%c0_48, %c1_49, %c2_50, %c0_51, %c0_52], %72 {strides = array<i32>} : memref<1x3x7x7x4xf32, #tpu.memory_space<vmem>>, vector<1x1x1x7x4xf32>,
    %73 = vector.extract_strided_slice %12 {offsets = [0, 1, 3, 0], sizes = [4, 1, 1, 7], strides = [1, 1, 1, 1]} : vector<4x3x7x7xf32> to vector<4x1x1x7xf32>
    %74 = vector.shape_cast %73 : vector<4x1x1x7xf32> to vector<4x7xf32>
    %75 = tpu.transpose %74, [1, 0] : vector<4x7xf32> -> vector<7x4xf32>
    %c0_53 = arith.constant 0 : index
    %c1_54 = arith.constant 1 : index
    %c3_55 = arith.constant 3 : index
    %c0_56 = arith.constant 0 : index
    %c0_57 = arith.constant 0 : index
    %76 = vector.load %arg4[%c0_53, %c1_54, %c3_55, %c0_56, %c0_57] : memref<1x3x7x7x4xf32, #tpu.memory_space<vmem>>, vector<1x1x1x7x4xf32>
    %77 = vector.shape_cast %76 : vector<1x1x1x7x4xf32> to vector<7x4xf32>
    %78 = vector.shape_cast %75 : vector<7x4xf32> to vector<1x1x1x7x4xf32>
    tpu.vector_store %arg4[%c0_53, %c1_54, %c3_55, %c0_56, %c0_57], %78 {strides = array<i32>} : memref<1x3x7x7x4xf32, #tpu.memory_space<vmem>>, vector<1x1x1x7x4xf32>,
    %79 = vector.extract_strided_slice %12 {offsets = [0, 1, 4, 0], sizes = [4, 1, 1, 7], strides = [1, 1, 1, 1]} : vector<4x3x7x7xf32> to vector<4x1x1x7xf32>
    %80 = vector.shape_cast %79 : vector<4x1x1x7xf32> to vector<4x7xf32>
    %81 = tpu.transpose %80, [1, 0] : vector<4x7xf32> -> vector<7x4xf32>
    %c0_58 = arith.constant 0 : index
    %c1_59 = arith.constant 1 : index
    %c4_60 = arith.constant 4 : index
    %c0_61 = arith.constant 0 : index
    %c0_62 = arith.constant 0 : index
    %82 = vector.load %arg4[%c0_58, %c1_59, %c4_60, %c0_61, %c0_62] : memref<1x3x7x7x4xf32, #tpu.memory_space<vmem>>, vector<1x1x1x7x4xf32>
    %83 = vector.shape_cast %82 : vector<1x1x1x7x4xf32> to vector<7x4xf32>
    %84 = vector.shape_cast %81 : vector<7x4xf32> to vector<1x1x1x7x4xf32>
    tpu.vector_store %arg4[%c0_58, %c1_59, %c4_60, %c0_61, %c0_62], %84 {strides = array<i32>} : memref<1x3x7x7x4xf32, #tpu.memory_space<vmem>>, vector<1x1x1x7x4xf32>,
    %85 = vector.extract_strided_slice %12 {offsets = [0, 1, 5, 0], sizes = [4, 1, 1, 7], strides = [1, 1, 1, 1]} : vector<4x3x7x7xf32> to vector<4x1x1x7xf32>
    %86 = vector.shape_cast %85 : vector<4x1x1x7xf32> to vector<4x7xf32>
    %87 = tpu.transpose %86, [1, 0] : vector<4x7xf32> -> vector<7x4xf32>
    %c0_63 = arith.constant 0 : index
    %c1_64 = arith.constant 1 : index
    %c5_65 = arith.constant 5 : index
    %c0_66 = arith.constant 0 : index
    %c0_67 = arith.constant 0 : index
    %88 = vector.load %arg4[%c0_63, %c1_64, %c5_65, %c0_66, %c0_67] : memref<1x3x7x7x4xf32, #tpu.memory_space<vmem>>, vector<1x1x1x7x4xf32>
    %89 = vector.shape_cast %88 : vector<1x1x1x7x4xf32> to vector<7x4xf32>
    %90 = vector.shape_cast %87 : vector<7x4xf32> to vector<1x1x1x7x4xf32>
    tpu.vector_store %arg4[%c0_63, %c1_64, %c5_65, %c0_66, %c0_67], %90 {strides = array<i32>} : memref<1x3x7x7x4xf32, #tpu.memory_space<vmem>>, vector<1x1x1x7x4xf32>,
    %91 = vector.extract_strided_slice %12 {offsets = [0, 1, 6, 0], sizes = [4, 1, 1, 7], strides = [1, 1, 1, 1]} : vector<4x3x7x7xf32> to vector<4x1x1x7xf32>
    %92 = vector.shape_cast %91 : vector<4x1x1x7xf32> to vector<4x7xf32>
    %93 = tpu.transpose %92, [1, 0] : vector<4x7xf32> -> vector<7x4xf32>
    %c0_68 = arith.constant 0 : index
    %c1_69 = arith.constant 1 : index
    %c6_70 = arith.constant 6 : index
    %c0_71 = arith.constant 0 : index
    %c0_72 = arith.constant 0 : index
    %94 = vector.load %arg4[%c0_68, %c1_69, %c6_70, %c0_71, %c0_72] : memref<1x3x7x7x4xf32, #tpu.memory_space<vmem>>, vector<1x1x1x7x4xf32>
    %95 = vector.shape_cast %94 : vector<1x1x1x7x4xf32> to vector<7x4xf32>
    %96 = vector.shape_cast %93 : vector<7x4xf32> to vector<1x1x1x7x4xf32>
    tpu.vector_store %arg4[%c0_68, %c1_69, %c6_70, %c0_71, %c0_72], %96 {strides = array<i32>} : memref<1x3x7x7x4xf32, #tpu.memory_space<vmem>>, vector<1x1x1x7x4xf32>,
    %97 = vector.extract_strided_slice %12 {offsets = [0, 2, 0, 0], sizes = [4, 1, 1, 7], strides = [1, 1, 1, 1]} : vector<4x3x7x7xf32> to vector<4x1x1x7xf32>
    %98 = vector.shape_cast %97 : vector<4x1x1x7xf32> to vector<4x7xf32>
    %99 = tpu.transpose %98, [1, 0] : vector<4x7xf32> -> vector<7x4xf32>
    %c0_73 = arith.constant 0 : index
    %c2_74 = arith.constant 2 : index
    %c0_75 = arith.constant 0 : index
    %c0_76 = arith.constant 0 : index
    %c0_77 = arith.constant 0 : index
    %100 = vector.load %arg4[%c0_73, %c2_74, %c0_75, %c0_76, %c0_77] : memref<1x3x7x7x4xf32, #tpu.memory_space<vmem>>, vector<1x1x1x7x4xf32>
    %101 = vector.shape_cast %100 : vector<1x1x1x7x4xf32> to vector<7x4xf32>
    %102 = vector.shape_cast %99 : vector<7x4xf32> to vector<1x1x1x7x4xf32>
    tpu.vector_store %arg4[%c0_73, %c2_74, %c0_75, %c0_76, %c0_77], %102 {strides = array<i32>} : memref<1x3x7x7x4xf32, #tpu.memory_space<vmem>>, vector<1x1x1x7x4xf32>,
    %103 = vector.extract_strided_slice %12 {offsets = [0, 2, 1, 0], sizes = [4, 1, 1, 7], strides = [1, 1, 1, 1]} : vector<4x3x7x7xf32> to vector<4x1x1x7xf32>
    %104 = vector.shape_cast %103 : vector<4x1x1x7xf32> to vector<4x7xf32>
    %105 = tpu.transpose %104, [1, 0] : vector<4x7xf32> -> vector<7x4xf32>
    %c0_78 = arith.constant 0 : index
    %c2_79 = arith.constant 2 : index
    %c1_80 = arith.constant 1 : index
    %c0_81 = arith.constant 0 : index
    %c0_82 = arith.constant 0 : index
    %106 = vector.load %arg4[%c0_78, %c2_79, %c1_80, %c0_81, %c0_82] : memref<1x3x7x7x4xf32, #tpu.memory_space<vmem>>, vector<1x1x1x7x4xf32>
    %107 = vector.shape_cast %106 : vector<1x1x1x7x4xf32> to vector<7x4xf32>
    %108 = vector.shape_cast %105 : vector<7x4xf32> to vector<1x1x1x7x4xf32>
    tpu.vector_store %arg4[%c0_78, %c2_79, %c1_80, %c0_81, %c0_82], %108 {strides = array<i32>} : memref<1x3x7x7x4xf32, #tpu.memory_space<vmem>>, vector<1x1x1x7x4xf32>,
    %109 = vector.extract_strided_slice %12 {offsets = [0, 2, 2, 0], sizes = [4, 1, 1, 7], strides = [1, 1, 1, 1]} : vector<4x3x7x7xf32> to vector<4x1x1x7xf32>
    %110 = vector.shape_cast %109 : vector<4x1x1x7xf32> to vector<4x7xf32>
    %111 = tpu.transpose %110, [1, 0] : vector<4x7xf32> -> vector<7x4xf32>
    %c0_83 = arith.constant 0 : index
    %c2_84 = arith.constant 2 : index
    %c2_85 = arith.constant 2 : index
    %c0_86 = arith.constant 0 : index
    %c0_87 = arith.constant 0 : index
    %112 = vector.load %arg4[%c0_83, %c2_84, %c2_85, %c0_86, %c0_87] : memref<1x3x7x7x4xf32, #tpu.memory_space<vmem>>, vector<1x1x1x7x4xf32>
    %113 = vector.shape_cast %112 : vector<1x1x1x7x4xf32> to vector<7x4xf32>
    %114 = vector.shape_cast %111 : vector<7x4xf32> to vector<1x1x1x7x4xf32>
    tpu.vector_store %arg4[%c0_83, %c2_84, %c2_85, %c0_86, %c0_87], %114 {strides = array<i32>} : memref<1x3x7x7x4xf32, #tpu.memory_space<vmem>>, vector<1x1x1x7x4xf32>,
    %115 = vector.extract_strided_slice %12 {offsets = [0, 2, 3, 0], sizes = [4, 1, 1, 7], strides = [1, 1, 1, 1]} : vector<4x3x7x7xf32> to vector<4x1x1x7xf32>
    %116 = vector.shape_cast %115 : vector<4x1x1x7xf32> to vector<4x7xf32>
    %117 = tpu.transpose %116, [1, 0] : vector<4x7xf32> -> vector<7x4xf32>
    %c0_88 = arith.constant 0 : index
    %c2_89 = arith.constant 2 : index
    %c3_90 = arith.constant 3 : index
    %c0_91 = arith.constant 0 : index
    %c0_92 = arith.constant 0 : index
    %118 = vector.load %arg4[%c0_88, %c2_89, %c3_90, %c0_91, %c0_92] : memref<1x3x7x7x4xf32, #tpu.memory_space<vmem>>, vector<1x1x1x7x4xf32>
    %119 = vector.shape_cast %118 : vector<1x1x1x7x4xf32> to vector<7x4xf32>
    %120 = vector.shape_cast %117 : vector<7x4xf32> to vector<1x1x1x7x4xf32>
    tpu.vector_store %arg4[%c0_88, %c2_89, %c3_90, %c0_91, %c0_92], %120 {strides = array<i32>} : memref<1x3x7x7x4xf32, #tpu.memory_space<vmem>>, vector<1x1x1x7x4xf32>,
    %121 = vector.extract_strided_slice %12 {offsets = [0, 2, 4, 0], sizes = [4, 1, 1, 7], strides = [1, 1, 1, 1]} : vector<4x3x7x7xf32> to vector<4x1x1x7xf32>
    %122 = vector.shape_cast %121 : vector<4x1x1x7xf32> to vector<4x7xf32>
    %123 = tpu.transpose %122, [1, 0] : vector<4x7xf32> -> vector<7x4xf32>
    %c0_93 = arith.constant 0 : index
    %c2_94 = arith.constant 2 : index
    %c4_95 = arith.constant 4 : index
    %c0_96 = arith.constant 0 : index
    %c0_97 = arith.constant 0 : index
    %124 = vector.load %arg4[%c0_93, %c2_94, %c4_95, %c0_96, %c0_97] : memref<1x3x7x7x4xf32, #tpu.memory_space<vmem>>, vector<1x1x1x7x4xf32>
    %125 = vector.shape_cast %124 : vector<1x1x1x7x4xf32> to vector<7x4xf32>
    %126 = vector.shape_cast %123 : vector<7x4xf32> to vector<1x1x1x7x4xf32>
    tpu.vector_store %arg4[%c0_93, %c2_94, %c4_95, %c0_96, %c0_97], %126 {strides = array<i32>} : memref<1x3x7x7x4xf32, #tpu.memory_space<vmem>>, vector<1x1x1x7x4xf32>,
    %127 = vector.extract_strided_slice %12 {offsets = [0, 2, 5, 0], sizes = [4, 1, 1, 7], strides = [1, 1, 1, 1]} : vector<4x3x7x7xf32> to vector<4x1x1x7xf32>
    %128 = vector.shape_cast %127 : vector<4x1x1x7xf32> to vector<4x7xf32>
    %129 = tpu.transpose %128, [1, 0] : vector<4x7xf32> -> vector<7x4xf32>
    %c0_98 = arith.constant 0 : index
    %c2_99 = arith.constant 2 : index
    %c5_100 = arith.constant 5 : index
    %c0_101 = arith.constant 0 : index
    %c0_102 = arith.constant 0 : index
    %130 = vector.load %arg4[%c0_98, %c2_99, %c5_100, %c0_101, %c0_102] : memref<1x3x7x7x4xf32, #tpu.memory_space<vmem>>, vector<1x1x1x7x4xf32>
    %131 = vector.shape_cast %130 : vector<1x1x1x7x4xf32> to vector<7x4xf32>
    %132 = vector.shape_cast %129 : vector<7x4xf32> to vector<1x1x1x7x4xf32>
    tpu.vector_store %arg4[%c0_98, %c2_99, %c5_100, %c0_101, %c0_102], %132 {strides = array<i32>} : memref<1x3x7x7x4xf32, #tpu.memory_space<vmem>>, vector<1x1x1x7x4xf32>,
    %133 = vector.extract_strided_slice %12 {offsets = [0, 2, 6, 0], sizes = [4, 1, 1, 7], strides = [1, 1, 1, 1]} : vector<4x3x7x7xf32> to vector<4x1x1x7xf32>
    %134 = vector.shape_cast %133 : vector<4x1x1x7xf32> to vector<4x7xf32>
    %135 = tpu.transpose %134, [1, 0] : vector<4x7xf32> -> vector<7x4xf32>
    %c0_103 = arith.constant 0 : index
    %c2_104 = arith.constant 2 : index
    %c6_105 = arith.constant 6 : index
    %c0_106 = arith.constant 0 : index
    %c0_107 = arith.constant 0 : index
    %136 = vector.load %arg4[%c0_103, %c2_104, %c6_105, %c0_106, %c0_107] : memref<1x3x7x7x4xf32, #tpu.memory_space<vmem>>, vector<1x1x1x7x4xf32>
    %137 = vector.shape_cast %136 : vector<1x1x1x7x4xf32> to vector<7x4xf32>
    %138 = vector.shape_cast %135 : vector<7x4xf32> to vector<1x1x1x7x4xf32>
    tpu.vector_store %arg4[%c0_103, %c2_104, %c6_105, %c0_106, %c0_107], %138 {strides = array<i32>} : memref<1x3x7x7x4xf32, #tpu.memory_space<vmem>>, vector<1x1x1x7x4xf32>,
    %c0_108 = arith.constant 0 : index
    %c0_109 = arith.constant 0 : index
    %c0_110 = arith.constant 0 : index
    %c0_111 = arith.constant 0 : index
    %c0_112 = arith.constant 0 : index
    %139 = vector.load %arg3[%c0_108, %c0_109, %c0_110, %c0_111, %c0_112] : memref<1x8x8x8x8xf32, #tpu.memory_space<vmem>>, vector<1x8x3x8x8xf32>
    %140 = vector.shape_cast %139 : vector<1x8x3x8x8xf32> to vector<8x3x8x8xf32>
    %c0_113 = arith.constant 0 : index
    %c0_114 = arith.constant 0 : index
    %c1_115 = arith.constant 1 : index
    %c0_116 = arith.constant 0 : index
    %c0_117 = arith.constant 0 : index
    %141 = vector.load %arg3[%c0_113, %c0_114, %c1_115, %c0_116, %c0_117] : memref<1x8x8x8x8xf32, #tpu.memory_space<vmem>>, vector<1x8x3x8x8xf32>
    %142 = vector.shape_cast %141 : vector<1x8x3x8x8xf32> to vector<8x3x8x8xf32>
    %143 = arith.addf %140, %142 : vector<8x3x8x8xf32>
    %c0_118 = arith.constant 0 : index
    %c0_119 = arith.constant 0 : index
    %c2_120 = arith.constant 2 : index
    %c0_121 = arith.constant 0 : index
    %c0_122 = arith.constant 0 : index
    %144 = vector.load %arg3[%c0_118, %c0_119, %c2_120, %c0_121, %c0_122] : memref<1x8x8x8x8xf32, #tpu.memory_space<vmem>>, vector<1x8x3x8x8xf32>
    %145 = vector.shape_cast %144 : vector<1x8x3x8x8xf32> to vector<8x3x8x8xf32>
    %146 = arith.addf %143, %145 : vector<8x3x8x8xf32>
    %c0_123 = arith.constant 0 : index
    %c0_124 = arith.constant 0 : index
    %c3_125 = arith.constant 3 : index
    %c0_126 = arith.constant 0 : index
    %c0_127 = arith.constant 0 : index
    %147 = vector.load %arg3[%c0_123, %c0_124, %c3_125, %c0_126, %c0_127] : memref<1x8x8x8x8xf32, #tpu.memory_space<vmem>>, vector<1x8x3x8x8xf32>
    %148 = vector.shape_cast %147 : vector<1x8x3x8x8xf32> to vector<8x3x8x8xf32>
    %149 = arith.addf %146, %148 : vector<8x3x8x8xf32>
    %c0_128 = arith.constant 0 : index
    %c0_129 = arith.constant 0 : index
    %c4_130 = arith.constant 4 : index
    %c0_131 = arith.constant 0 : index
    %c0_132 = arith.constant 0 : index
    %150 = vector.load %arg3[%c0_128, %c0_129, %c4_130, %c0_131, %c0_132] : memref<1x8x8x8x8xf32, #tpu.memory_space<vmem>>, vector<1x8x3x8x8xf32>
    %151 = vector.shape_cast %150 : vector<1x8x3x8x8xf32> to vector<8x3x8x8xf32>
    %152 = arith.addf %149, %151 : vector<8x3x8x8xf32>
    %c0_133 = arith.constant 0 : index
    %c0_134 = arith.constant 0 : index
    %c5_135 = arith.constant 5 : index
    %c0_136 = arith.constant 0 : index
    %c0_137 = arith.constant 0 : index
    %153 = vector.load %arg3[%c0_133, %c0_134, %c5_135, %c0_136, %c0_137] : memref<1x8x8x8x8xf32, #tpu.memory_space<vmem>>, vector<1x8x3x8x8xf32>
    %154 = vector.shape_cast %153 : vector<1x8x3x8x8xf32> to vector<8x3x8x8xf32>
    %155 = arith.addf %152, %154 : vector<8x3x8x8xf32>
    %156 = vector.extract_strided_slice %155 {offsets = [0, 0, 0, 0], sizes = [8, 3, 7, 8], strides = [1, 1, 1, 1]} : vector<8x3x8x8xf32> to vector<8x3x7x8xf32>
    %157 = vector.extract_strided_slice %155 {offsets = [0, 0, 1, 0], sizes = [8, 3, 7, 8], strides = [1, 1, 1, 1]} : vector<8x3x8x8xf32> to vector<8x3x7x8xf32>
    %158 = arith.addf %156, %157 : vector<8x3x7x8xf32>
    %159 = vector.extract_strided_slice %158 {offsets = [0, 0, 0, 0], sizes = [8, 3, 7, 7], strides = [1, 1, 1, 1]} : vector<8x3x7x8xf32> to vector<8x3x7x7xf32>
    %160 = vector.extract_strided_slice %158 {offsets = [0, 0, 0, 1], sizes = [8, 3, 7, 7], strides = [1, 1, 1, 1]} : vector<8x3x7x8xf32> to vector<8x3x7x7xf32>
    %161 = arith.addf %159, %160 : vector<8x3x7x7xf32>
    %cst_138 = arith.constant 0.0416666679 : f32
    %162 = vector.broadcast %cst_138 : f32 to vector<8x3x7x7xf32>
    %163 = arith.mulf %161, %162 : vector<8x3x7x7xf32>
    %164 = vector.extract_strided_slice %163 {offsets = [0, 0, 0, 0], sizes = [8, 1, 1, 7], strides = [1, 1, 1, 1]} : vector<8x3x7x7xf32> to vector<8x1x1x7xf32>
    %165 = vector.shape_cast %164 : vector<8x1x1x7xf32> to vector<8x7xf32>
    %166 = tpu.transpose %165, [1, 0] : vector<8x7xf32> -> vector<7x8xf32>
    %c0_139 = arith.constant 0 : index
    %c0_140 = arith.constant 0 : index
    %c0_141 = arith.constant 0 : index
    %c0_142 = arith.constant 0 : index
    %c0_143 = arith.constant 0 : index
    %167 = vector.load %arg5[%c0_139, %c0_140, %c0_141, %c0_142, %c0_143] : memref<1x3x7x7x8xf32, #tpu.memory_space<vmem>>, vector<1x1x1x7x8xf32>
    %168 = vector.shape_cast %167 : vector<1x1x1x7x8xf32> to vector<7x8xf32>
    %169 = vector.shape_cast %166 : vector<7x8xf32> to vector<1x1x1x7x8xf32>
    tpu.vector_store %arg5[%c0_139, %c0_140, %c0_141, %c0_142, %c0_143], %169 {strides = array<i32>} : memref<1x3x7x7x8xf32, #tpu.memory_space<vmem>>, vector<1x1x1x7x8xf32>,
    %170 = vector.extract_strided_slice %163 {offsets = [0, 0, 1, 0], sizes = [8, 1, 1, 7], strides = [1, 1, 1, 1]} : vector<8x3x7x7xf32> to vector<8x1x1x7xf32>
    %171 = vector.shape_cast %170 : vector<8x1x1x7xf32> to vector<8x7xf32>
    %172 = tpu.transpose %171, [1, 0] : vector<8x7xf32> -> vector<7x8xf32>
    %c0_144 = arith.constant 0 : index
    %c0_145 = arith.constant 0 : index
    %c1_146 = arith.constant 1 : index
    %c0_147 = arith.constant 0 : index
    %c0_148 = arith.constant 0 : index
    %173 = vector.load %arg5[%c0_144, %c0_145, %c1_146, %c0_147, %c0_148] : memref<1x3x7x7x8xf32, #tpu.memory_space<vmem>>, vector<1x1x1x7x8xf32>
    %174 = vector.shape_cast %173 : vector<1x1x1x7x8xf32> to vector<7x8xf32>
    %175 = vector.shape_cast %172 : vector<7x8xf32> to vector<1x1x1x7x8xf32>
    tpu.vector_store %arg5[%c0_144, %c0_145, %c1_146, %c0_147, %c0_148], %175 {strides = array<i32>} : memref<1x3x7x7x8xf32, #tpu.memory_space<vmem>>, vector<1x1x1x7x8xf32>,
    %176 = vector.extract_strided_slice %163 {offsets = [0, 0, 2, 0], sizes = [8, 1, 1, 7], strides = [1, 1, 1, 1]} : vector<8x3x7x7xf32> to vector<8x1x1x7xf32>
    %177 = vector.shape_cast %176 : vector<8x1x1x7xf32> to vector<8x7xf32>
    %178 = tpu.transpose %177, [1, 0] : vector<8x7xf32> -> vector<7x8xf32>
    %c0_149 = arith.constant 0 : index
    %c0_150 = arith.constant 0 : index
    %c2_151 = arith.constant 2 : index
    %c0_152 = arith.constant 0 : index
    %c0_153 = arith.constant 0 : index
    %179 = vector.load %arg5[%c0_149, %c0_150, %c2_151, %c0_152, %c0_153] : memref<1x3x7x7x8xf32, #tpu.memory_space<vmem>>, vector<1x1x1x7x8xf32>
    %180 = vector.shape_cast %179 : vector<1x1x1x7x8xf32> to vector<7x8xf32>
    %181 = vector.shape_cast %178 : vector<7x8xf32> to vector<1x1x1x7x8xf32>
    tpu.vector_store %arg5[%c0_149, %c0_150, %c2_151, %c0_152, %c0_153], %181 {strides = array<i32>} : memref<1x3x7x7x8xf32, #tpu.memory_space<vmem>>, vector<1x1x1x7x8xf32>,
    %182 = vector.extract_strided_slice %163 {offsets = [0, 0, 3, 0], sizes = [8, 1, 1, 7], strides = [1, 1, 1, 1]} : vector<8x3x7x7xf32> to vector<8x1x1x7xf32>
    %183 = vector.shape_cast %182 : vector<8x1x1x7xf32> to vector<8x7xf32>
    %184 = tpu.transpose %183, [1, 0] : vector<8x7xf32> -> vector<7x8xf32>
    %c0_154 = arith.constant 0 : index
    %c0_155 = arith.constant 0 : index
    %c3_156 = arith.constant 3 : index
    %c0_157 = arith.constant 0 : index
    %c0_158 = arith.constant 0 : index
    %185 = vector.load %arg5[%c0_154, %c0_155, %c3_156, %c0_157, %c0_158] : memref<1x3x7x7x8xf32, #tpu.memory_space<vmem>>, vector<1x1x1x7x8xf32>
    %186 = vector.shape_cast %185 : vector<1x1x1x7x8xf32> to vector<7x8xf32>
    %187 = vector.shape_cast %184 : vector<7x8xf32> to vector<1x1x1x7x8xf32>
    tpu.vector_store %arg5[%c0_154, %c0_155, %c3_156, %c0_157, %c0_158], %187 {strides = array<i32>} : memref<1x3x7x7x8xf32, #tpu.memory_space<vmem>>, vector<1x1x1x7x8xf32>,
    %188 = vector.extract_strided_slice %163 {offsets = [0, 0, 4, 0], sizes = [8, 1, 1, 7], strides = [1, 1, 1, 1]} : vector<8x3x7x7xf32> to vector<8x1x1x7xf32>
    %189 = vector.shape_cast %188 : vector<8x1x1x7xf32> to vector<8x7xf32>
    %190 = tpu.transpose %189, [1, 0] : vector<8x7xf32> -> vector<7x8xf32>
    %c0_159 = arith.constant 0 : index
    %c0_160 = arith.constant 0 : index
    %c4_161 = arith.constant 4 : index
    %c0_162 = arith.constant 0 : index
    %c0_163 = arith.constant 0 : index
    %191 = vector.load %arg5[%c0_159, %c0_160, %c4_161, %c0_162, %c0_163] : memref<1x3x7x7x8xf32, #tpu.memory_space<vmem>>, vector<1x1x1x7x8xf32>
    %192 = vector.shape_cast %191 : vector<1x1x1x7x8xf32> to vector<7x8xf32>
    %193 = vector.shape_cast %190 : vector<7x8xf32> to vector<1x1x1x7x8xf32>
    tpu.vector_store %arg5[%c0_159, %c0_160, %c4_161, %c0_162, %c0_163], %193 {strides = array<i32>} : memref<1x3x7x7x8xf32, #tpu.memory_space<vmem>>, vector<1x1x1x7x8xf32>,
    %194 = vector.extract_strided_slice %163 {offsets = [0, 0, 5, 0], sizes = [8, 1, 1, 7], strides = [1, 1, 1, 1]} : vector<8x3x7x7xf32> to vector<8x1x1x7xf32>
    %195 = vector.shape_cast %194 : vector<8x1x1x7xf32> to vector<8x7xf32>
    %196 = tpu.transpose %195, [1, 0] : vector<8x7xf32> -> vector<7x8xf32>
    %c0_164 = arith.constant 0 : index
    %c0_165 = arith.constant 0 : index
    %c5_166 = arith.constant 5 : index
    %c0_167 = arith.constant 0 : index
    %c0_168 = arith.constant 0 : index
    %197 = vector.load %arg5[%c0_164, %c0_165, %c5_166, %c0_167, %c0_168] : memref<1x3x7x7x8xf32, #tpu.memory_space<vmem>>, vector<1x1x1x7x8xf32>
    %198 = vector.shape_cast %197 : vector<1x1x1x7x8xf32> to vector<7x8xf32>
    %199 = vector.shape_cast %196 : vector<7x8xf32> to vector<1x1x1x7x8xf32>
    tpu.vector_store %arg5[%c0_164, %c0_165, %c5_166, %c0_167, %c0_168], %199 {strides = array<i32>} : memref<1x3x7x7x8xf32, #tpu.memory_space<vmem>>, vector<1x1x1x7x8xf32>,
    %200 = vector.extract_strided_slice %163 {offsets = [0, 0, 6, 0], sizes = [8, 1, 1, 7], strides = [1, 1, 1, 1]} : vector<8x3x7x7xf32> to vector<8x1x1x7xf32>
    %201 = vector.shape_cast %200 : vector<8x1x1x7xf32> to vector<8x7xf32>
    %202 = tpu.transpose %201, [1, 0] : vector<8x7xf32> -> vector<7x8xf32>
    %c0_169 = arith.constant 0 : index
    %c0_170 = arith.constant 0 : index
    %c6_171 = arith.constant 6 : index
    %c0_172 = arith.constant 0 : index
    %c0_173 = arith.constant 0 : index
    %203 = vector.load %arg5[%c0_169, %c0_170, %c6_171, %c0_172, %c0_173] : memref<1x3x7x7x8xf32, #tpu.memory_space<vmem>>, vector<1x1x1x7x8xf32>
    %204 = vector.shape_cast %203 : vector<1x1x1x7x8xf32> to vector<7x8xf32>
    %205 = vector.shape_cast %202 : vector<7x8xf32> to vector<1x1x1x7x8xf32>
    tpu.vector_store %arg5[%c0_169, %c0_170, %c6_171, %c0_172, %c0_173], %205 {strides = array<i32>} : memref<1x3x7x7x8xf32, #tpu.memory_space<vmem>>, vector<1x1x1x7x8xf32>,
    %206 = vector.extract_strided_slice %163 {offsets = [0, 1, 0, 0], sizes = [8, 1, 1, 7], strides = [1, 1, 1, 1]} : vector<8x3x7x7xf32> to vector<8x1x1x7xf32>
    %207 = vector.shape_cast %206 : vector<8x1x1x7xf32> to vector<8x7xf32>
    %208 = tpu.transpose %207, [1, 0] : vector<8x7xf32> -> vector<7x8xf32>
    %c0_174 = arith.constant 0 : index
    %c1_175 = arith.constant 1 : index
    %c0_176 = arith.constant 0 : index
    %c0_177 = arith.constant 0 : index
    %c0_178 = arith.constant 0 : index
    %209 = vector.load %arg5[%c0_174, %c1_175, %c0_176, %c0_177, %c0_178] : memref<1x3x7x7x8xf32, #tpu.memory_space<vmem>>, vector<1x1x1x7x8xf32>
    %210 = vector.shape_cast %209 : vector<1x1x1x7x8xf32> to vector<7x8xf32>
    %211 = vector.shape_cast %208 : vector<7x8xf32> to vector<1x1x1x7x8xf32>
    tpu.vector_store %arg5[%c0_174, %c1_175, %c0_176, %c0_177, %c0_178], %211 {strides = array<i32>} : memref<1x3x7x7x8xf32, #tpu.memory_space<vmem>>, vector<1x1x1x7x8xf32>,
    %212 = vector.extract_strided_slice %163 {offsets = [0, 1, 1, 0], sizes = [8, 1, 1, 7], strides = [1, 1, 1, 1]} : vector<8x3x7x7xf32> to vector<8x1x1x7xf32>
    %213 = vector.shape_cast %212 : vector<8x1x1x7xf32> to vector<8x7xf32>
    %214 = tpu.transpose %213, [1, 0] : vector<8x7xf32> -> vector<7x8xf32>
    %c0_179 = arith.constant 0 : index
    %c1_180 = arith.constant 1 : index
    %c1_181 = arith.constant 1 : index
    %c0_182 = arith.constant 0 : index
    %c0_183 = arith.constant 0 : index
    %215 = vector.load %arg5[%c0_179, %c1_180, %c1_181, %c0_182, %c0_183] : memref<1x3x7x7x8xf32, #tpu.memory_space<vmem>>, vector<1x1x1x7x8xf32>
    %216 = vector.shape_cast %215 : vector<1x1x1x7x8xf32> to vector<7x8xf32>
    %217 = vector.shape_cast %214 : vector<7x8xf32> to vector<1x1x1x7x8xf32>
    tpu.vector_store %arg5[%c0_179, %c1_180, %c1_181, %c0_182, %c0_183], %217 {strides = array<i32>} : memref<1x3x7x7x8xf32, #tpu.memory_space<vmem>>, vector<1x1x1x7x8xf32>,
    %218 = vector.extract_strided_slice %163 {offsets = [0, 1, 2, 0], sizes = [8, 1, 1, 7], strides = [1, 1, 1, 1]} : vector<8x3x7x7xf32> to vector<8x1x1x7xf32>
    %219 = vector.shape_cast %218 : vector<8x1x1x7xf32> to vector<8x7xf32>
    %220 = tpu.transpose %219, [1, 0] : vector<8x7xf32> -> vector<7x8xf32>
    %c0_184 = arith.constant 0 : index
    %c1_185 = arith.constant 1 : index
    %c2_186 = arith.constant 2 : index
    %c0_187 = arith.constant 0 : index
    %c0_188 = arith.constant 0 : index
    %221 = vector.load %arg5[%c0_184, %c1_185, %c2_186, %c0_187, %c0_188] : memref<1x3x7x7x8xf32, #tpu.memory_space<vmem>>, vector<1x1x1x7x8xf32>
    %222 = vector.shape_cast %221 : vector<1x1x1x7x8xf32> to vector<7x8xf32>
    %223 = vector.shape_cast %220 : vector<7x8xf32> to vector<1x1x1x7x8xf32>
    tpu.vector_store %arg5[%c0_184, %c1_185, %c2_186, %c0_187, %c0_188], %223 {strides = array<i32>} : memref<1x3x7x7x8xf32, #tpu.memory_space<vmem>>, vector<1x1x1x7x8xf32>,
    %224 = vector.extract_strided_slice %163 {offsets = [0, 1, 3, 0], sizes = [8, 1, 1, 7], strides = [1, 1, 1, 1]} : vector<8x3x7x7xf32> to vector<8x1x1x7xf32>
    %225 = vector.shape_cast %224 : vector<8x1x1x7xf32> to vector<8x7xf32>
    %226 = tpu.transpose %225, [1, 0] : vector<8x7xf32> -> vector<7x8xf32>
    %c0_189 = arith.constant 0 : index
    %c1_190 = arith.constant 1 : index
    %c3_191 = arith.constant 3 : index
    %c0_192 = arith.constant 0 : index
    %c0_193 = arith.constant 0 : index
    %227 = vector.load %arg5[%c0_189, %c1_190, %c3_191, %c0_192, %c0_193] : memref<1x3x7x7x8xf32, #tpu.memory_space<vmem>>, vector<1x1x1x7x8xf32>
    %228 = vector.shape_cast %227 : vector<1x1x1x7x8xf32> to vector<7x8xf32>
    %229 = vector.shape_cast %226 : vector<7x8xf32> to vector<1x1x1x7x8xf32>
    tpu.vector_store %arg5[%c0_189, %c1_190, %c3_191, %c0_192, %c0_193], %229 {strides = array<i32>} : memref<1x3x7x7x8xf32, #tpu.memory_space<vmem>>, vector<1x1x1x7x8xf32>,
    %230 = vector.extract_strided_slice %163 {offsets = [0, 1, 4, 0], sizes = [8, 1, 1, 7], strides = [1, 1, 1, 1]} : vector<8x3x7x7xf32> to vector<8x1x1x7xf32>
    %231 = vector.shape_cast %230 : vector<8x1x1x7xf32> to vector<8x7xf32>
    %232 = tpu.transpose %231, [1, 0] : vector<8x7xf32> -> vector<7x8xf32>
    %c0_194 = arith.constant 0 : index
    %c1_195 = arith.constant 1 : index
    %c4_196 = arith.constant 4 : index
    %c0_197 = arith.constant 0 : index
    %c0_198 = arith.constant 0 : index
    %233 = vector.load %arg5[%c0_194, %c1_195, %c4_196, %c0_197, %c0_198] : memref<1x3x7x7x8xf32, #tpu.memory_space<vmem>>, vector<1x1x1x7x8xf32>
    %234 = vector.shape_cast %233 : vector<1x1x1x7x8xf32> to vector<7x8xf32>
    %235 = vector.shape_cast %232 : vector<7x8xf32> to vector<1x1x1x7x8xf32>
    tpu.vector_store %arg5[%c0_194, %c1_195, %c4_196, %c0_197, %c0_198], %235 {strides = array<i32>} : memref<1x3x7x7x8xf32, #tpu.memory_space<vmem>>, vector<1x1x1x7x8xf32>,
    %236 = vector.extract_strided_slice %163 {offsets = [0, 1, 5, 0], sizes = [8, 1, 1, 7], strides = [1, 1, 1, 1]} : vector<8x3x7x7xf32> to vector<8x1x1x7xf32>
    %237 = vector.shape_cast %236 : vector<8x1x1x7xf32> to vector<8x7xf32>
    %238 = tpu.transpose %237, [1, 0] : vector<8x7xf32> -> vector<7x8xf32>
    %c0_199 = arith.constant 0 : index
    %c1_200 = arith.constant 1 : index
    %c5_201 = arith.constant 5 : index
    %c0_202 = arith.constant 0 : index
    %c0_203 = arith.constant 0 : index
    %239 = vector.load %arg5[%c0_199, %c1_200, %c5_201, %c0_202, %c0_203] : memref<1x3x7x7x8xf32, #tpu.memory_space<vmem>>, vector<1x1x1x7x8xf32>
    %240 = vector.shape_cast %239 : vector<1x1x1x7x8xf32> to vector<7x8xf32>
    %241 = vector.shape_cast %238 : vector<7x8xf32> to vector<1x1x1x7x8xf32>
    tpu.vector_store %arg5[%c0_199, %c1_200, %c5_201, %c0_202, %c0_203], %241 {strides = array<i32>} : memref<1x3x7x7x8xf32, #tpu.memory_space<vmem>>, vector<1x1x1x7x8xf32>,
    %242 = vector.extract_strided_slice %163 {offsets = [0, 1, 6, 0], sizes = [8, 1, 1, 7], strides = [1, 1, 1, 1]} : vector<8x3x7x7xf32> to vector<8x1x1x7xf32>
    %243 = vector.shape_cast %242 : vector<8x1x1x7xf32> to vector<8x7xf32>
    %244 = tpu.transpose %243, [1, 0] : vector<8x7xf32> -> vector<7x8xf32>
    %c0_204 = arith.constant 0 : index
    %c1_205 = arith.constant 1 : index
    %c6_206 = arith.constant 6 : index
    %c0_207 = arith.constant 0 : index
    %c0_208 = arith.constant 0 : index
    %245 = vector.load %arg5[%c0_204, %c1_205, %c6_206, %c0_207, %c0_208] : memref<1x3x7x7x8xf32, #tpu.memory_space<vmem>>, vector<1x1x1x7x8xf32>
    %246 = vector.shape_cast %245 : vector<1x1x1x7x8xf32> to vector<7x8xf32>
    %247 = vector.shape_cast %244 : vector<7x8xf32> to vector<1x1x1x7x8xf32>
    tpu.vector_store %arg5[%c0_204, %c1_205, %c6_206, %c0_207, %c0_208], %247 {strides = array<i32>} : memref<1x3x7x7x8xf32, #tpu.memory_space<vmem>>, vector<1x1x1x7x8xf32>,
    %248 = vector.extract_strided_slice %163 {offsets = [0, 2, 0, 0], sizes = [8, 1, 1, 7], strides = [1, 1, 1, 1]} : vector<8x3x7x7xf32> to vector<8x1x1x7xf32>
    %249 = vector.shape_cast %248 : vector<8x1x1x7xf32> to vector<8x7xf32>
    %250 = tpu.transpose %249, [1, 0] : vector<8x7xf32> -> vector<7x8xf32>
    %c0_209 = arith.constant 0 : index
    %c2_210 = arith.constant 2 : index
    %c0_211 = arith.constant 0 : index
    %c0_212 = arith.constant 0 : index
    %c0_213 = arith.constant 0 : index
    %251 = vector.load %arg5[%c0_209, %c2_210, %c0_211, %c0_212, %c0_213] : memref<1x3x7x7x8xf32, #tpu.memory_space<vmem>>, vector<1x1x1x7x8xf32>
    %252 = vector.shape_cast %251 : vector<1x1x1x7x8xf32> to vector<7x8xf32>
    %253 = vector.shape_cast %250 : vector<7x8xf32> to vector<1x1x1x7x8xf32>
    tpu.vector_store %arg5[%c0_209, %c2_210, %c0_211, %c0_212, %c0_213], %253 {strides = array<i32>} : memref<1x3x7x7x8xf32, #tpu.memory_space<vmem>>, vector<1x1x1x7x8xf32>,
    %254 = vector.extract_strided_slice %163 {offsets = [0, 2, 1, 0], sizes = [8, 1, 1, 7], strides = [1, 1, 1, 1]} : vector<8x3x7x7xf32> to vector<8x1x1x7xf32>
    %255 = vector.shape_cast %254 : vector<8x1x1x7xf32> to vector<8x7xf32>
    %256 = tpu.transpose %255, [1, 0] : vector<8x7xf32> -> vector<7x8xf32>
    %c0_214 = arith.constant 0 : index
    %c2_215 = arith.constant 2 : index
    %c1_216 = arith.constant 1 : index
    %c0_217 = arith.constant 0 : index
    %c0_218 = arith.constant 0 : index
    %257 = vector.load %arg5[%c0_214, %c2_215, %c1_216, %c0_217, %c0_218] : memref<1x3x7x7x8xf32, #tpu.memory_space<vmem>>, vector<1x1x1x7x8xf32>
    %258 = vector.shape_cast %257 : vector<1x1x1x7x8xf32> to vector<7x8xf32>
    %259 = vector.shape_cast %256 : vector<7x8xf32> to vector<1x1x1x7x8xf32>
    tpu.vector_store %arg5[%c0_214, %c2_215, %c1_216, %c0_217, %c0_218], %259 {strides = array<i32>} : memref<1x3x7x7x8xf32, #tpu.memory_space<vmem>>, vector<1x1x1x7x8xf32>,
    %260 = vector.extract_strided_slice %163 {offsets = [0, 2, 2, 0], sizes = [8, 1, 1, 7], strides = [1, 1, 1, 1]} : vector<8x3x7x7xf32> to vector<8x1x1x7xf32>
    %261 = vector.shape_cast %260 : vector<8x1x1x7xf32> to vector<8x7xf32>
    %262 = tpu.transpose %261, [1, 0] : vector<8x7xf32> -> vector<7x8xf32>
    %c0_219 = arith.constant 0 : index
    %c2_220 = arith.constant 2 : index
    %c2_221 = arith.constant 2 : index
    %c0_222 = arith.constant 0 : index
    %c0_223 = arith.constant 0 : index
    %263 = vector.load %arg5[%c0_219, %c2_220, %c2_221, %c0_222, %c0_223] : memref<1x3x7x7x8xf32, #tpu.memory_space<vmem>>, vector<1x1x1x7x8xf32>
    %264 = vector.shape_cast %263 : vector<1x1x1x7x8xf32> to vector<7x8xf32>
    %265 = vector.shape_cast %262 : vector<7x8xf32> to vector<1x1x1x7x8xf32>
    tpu.vector_store %arg5[%c0_219, %c2_220, %c2_221, %c0_222, %c0_223], %265 {strides = array<i32>} : memref<1x3x7x7x8xf32, #tpu.memory_space<vmem>>, vector<1x1x1x7x8xf32>,
    %266 = vector.extract_strided_slice %163 {offsets = [0, 2, 3, 0], sizes = [8, 1, 1, 7], strides = [1, 1, 1, 1]} : vector<8x3x7x7xf32> to vector<8x1x1x7xf32>
    %267 = vector.shape_cast %266 : vector<8x1x1x7xf32> to vector<8x7xf32>
    %268 = tpu.transpose %267, [1, 0] : vector<8x7xf32> -> vector<7x8xf32>
    %c0_224 = arith.constant 0 : index
    %c2_225 = arith.constant 2 : index
    %c3_226 = arith.constant 3 : index
    %c0_227 = arith.constant 0 : index
    %c0_228 = arith.constant 0 : index
    %269 = vector.load %arg5[%c0_224, %c2_225, %c3_226, %c0_227, %c0_228] : memref<1x3x7x7x8xf32, #tpu.memory_space<vmem>>, vector<1x1x1x7x8xf32>
    %270 = vector.shape_cast %269 : vector<1x1x1x7x8xf32> to vector<7x8xf32>
    %271 = vector.shape_cast %268 : vector<7x8xf32> to vector<1x1x1x7x8xf32>
    tpu.vector_store %arg5[%c0_224, %c2_225, %c3_226, %c0_227, %c0_228], %271 {strides = array<i32>} : memref<1x3x7x7x8xf32, #tpu.memory_space<vmem>>, vector<1x1x1x7x8xf32>,
    %272 = vector.extract_strided_slice %163 {offsets = [0, 2, 4, 0], sizes = [8, 1, 1, 7], strides = [1, 1, 1, 1]} : vector<8x3x7x7xf32> to vector<8x1x1x7xf32>
    %273 = vector.shape_cast %272 : vector<8x1x1x7xf32> to vector<8x7xf32>
    %274 = tpu.transpose %273, [1, 0] : vector<8x7xf32> -> vector<7x8xf32>
    %c0_229 = arith.constant 0 : index
    %c2_230 = arith.constant 2 : index
    %c4_231 = arith.constant 4 : index
    %c0_232 = arith.constant 0 : index
    %c0_233 = arith.constant 0 : index
    %275 = vector.load %arg5[%c0_229, %c2_230, %c4_231, %c0_232, %c0_233] : memref<1x3x7x7x8xf32, #tpu.memory_space<vmem>>, vector<1x1x1x7x8xf32>
    %276 = vector.shape_cast %275 : vector<1x1x1x7x8xf32> to vector<7x8xf32>
    %277 = vector.shape_cast %274 : vector<7x8xf32> to vector<1x1x1x7x8xf32>
    tpu.vector_store %arg5[%c0_229, %c2_230, %c4_231, %c0_232, %c0_233], %277 {strides = array<i32>} : memref<1x3x7x7x8xf32, #tpu.memory_space<vmem>>, vector<1x1x1x7x8xf32>,
    %278 = vector.extract_strided_slice %163 {offsets = [0, 2, 5, 0], sizes = [8, 1, 1, 7], strides = [1, 1, 1, 1]} : vector<8x3x7x7xf32> to vector<8x1x1x7xf32>
    %279 = vector.shape_cast %278 : vector<8x1x1x7xf32> to vector<8x7xf32>
    %280 = tpu.transpose %279, [1, 0] : vector<8x7xf32> -> vector<7x8xf32>
    %c0_234 = arith.constant 0 : index
    %c2_235 = arith.constant 2 : index
    %c5_236 = arith.constant 5 : index
    %c0_237 = arith.constant 0 : index
    %c0_238 = arith.constant 0 : index
    %281 = vector.load %arg5[%c0_234, %c2_235, %c5_236, %c0_237, %c0_238] : memref<1x3x7x7x8xf32, #tpu.memory_space<vmem>>, vector<1x1x1x7x8xf32>
    %282 = vector.shape_cast %281 : vector<1x1x1x7x8xf32> to vector<7x8xf32>
    %283 = vector.shape_cast %280 : vector<7x8xf32> to vector<1x1x1x7x8xf32>
    tpu.vector_store %arg5[%c0_234, %c2_235, %c5_236, %c0_237, %c0_238], %283 {strides = array<i32>} : memref<1x3x7x7x8xf32, #tpu.memory_space<vmem>>, vector<1x1x1x7x8xf32>,
    %284 = vector.extract_strided_slice %163 {offsets = [0, 2, 6, 0], sizes = [8, 1, 1, 7], strides = [1, 1, 1, 1]} : vector<8x3x7x7xf32> to vector<8x1x1x7xf32>
    %285 = vector.shape_cast %284 : vector<8x1x1x7xf32> to vector<8x7xf32>
    %286 = tpu.transpose %285, [1, 0] : vector<8x7xf32> -> vector<7x8xf32>
    %c0_239 = arith.constant 0 : index
    %c2_240 = arith.constant 2 : index
    %c6_241 = arith.constant 6 : index
    %c0_242 = arith.constant 0 : index
    %c0_243 = arith.constant 0 : index
    %287 = vector.load %arg5[%c0_239, %c2_240, %c6_241, %c0_242, %c0_243] : memref<1x3x7x7x8xf32, #tpu.memory_space<vmem>>, vector<1x1x1x7x8xf32>
    %288 = vector.shape_cast %287 : vector<1x1x1x7x8xf32> to vector<7x8xf32>
    %289 = vector.shape_cast %286 : vector<7x8xf32> to vector<1x1x1x7x8xf32>
    tpu.vector_store %arg5[%c0_239, %c2_240, %c6_241, %c0_242, %c0_243], %289 {strides = array<i32>} : memref<1x3x7x7x8xf32, #tpu.memory_space<vmem>>, vector<1x1x1x7x8xf32>,
    return
  }
  func.func @transform_0(%arg0: i32, %arg1: i32) -> (i32, i32, i32, i32, i32) {
    %c0_i32 = arith.constant 0 : i32
    %c0_i32_0 = arith.constant 0 : i32
    %c0_i32_1 = arith.constant 0 : i32
    %c0_i32_2 = arith.constant 0 : i32
    return %arg0, %arg1, %c0_i32, %c0_i32_0, %c0_i32_1 : i32, i32, i32, i32, i32
  }
  func.func @transform_1(%arg0: i32, %arg1: i32) -> (i32, i32, i32, i32, i32) {
    %c0_i32 = arith.constant 0 : i32
    %c0_i32_0 = arith.constant 0 : i32
    %c0_i32_1 = arith.constant 0 : i32
    %c0_i32_2 = arith.constant 0 : i32
    return %arg0, %arg1, %c0_i32, %c0_i32_0, %c0_i32_1 : i32, i32, i32, i32, i32
  }
  func.func @transform_2(%arg0: i32, %arg1: i32) -> (i32, i32, i32, i32, i32) {
    %c0_i32 = arith.constant 0 : i32
    %c0_i32_0 = arith.constant 0 : i32
    %c0_i32_1 = arith.constant 0 : i32
    %c0_i32_2 = arith.constant 0 : i32
    return %arg0, %c0_i32, %c0_i32_0, %c0_i32_1, %arg1 : i32, i32, i32, i32, i32
  }
  func.func @transform_3(%arg0: i32, %arg1: i32) -> (i32, i32, i32, i32, i32) {
    %c0_i32 = arith.constant 0 : i32
    %c0_i32_0 = arith.constant 0 : i32
    %c0_i32_1 = arith.constant 0 : i32
    %c0_i32_2 = arith.constant 0 : i32
    return %arg0, %c0_i32, %c0_i32_0, %c0_i32_1, %arg1 : i32, i32, i32, i32, i32
  }
}

</mosaic_0001>

<bundles_post_ra>
// kernel: tpu_custom_call.1
= control target key start
LH: loop header
LB: loop body
LE: loop exit
PB: predicated region body
PF: predicated region fallthrough
CT: control target
= control target key end

     0   :  { %9 = vsyncpa [#allocation3], 0  ;;  %s4658_s0 = inlined_call_operand.hbm [shape: f32[2,4,4,8,8], index: 0, kind: input, shape index: {}]   ;;  %s4659_s1 = inlined_call_operand.hbm [shape: f32[2,8,8,8,8], index: 1, kind: input, shape index: {}]   ;;  %s4660_s2 = inlined_call_operand.vmem [shape: f32[2,3,7,7,4], index: 2, kind: output, shape index: {0}]   ;;  %s4661_s3 = inlined_call_operand.vmem [shape: f32[2,3,7,7,8], index: 3, kind: output, shape index: {1}]  }
   0x1   :  { %11 = vsyncpa [#allocation3 + $0x1], 0 }
   0x2   :  { %12 = vsyncpa [#allocation5], 0 }
   0x3   :  { %14 = vsyncpa [#allocation5 + $0x1], 0  ;;  %s3456_s12 = smov 0   ;;  %s3458_s13 = smov 0  }
   0x4   :  { %s3460_s14 = smov 0   ;;  %s3462_s15 = smov 0  }
   0x5   :  { %s3464_s16 = smov 0   ;;  %s3466_s17 = smov 0  }
   0x6 LB: > { %s3061_s18 = sadd.s32 4294967295, %s3431_s17   ;;  %s32_s19 = sadd.s32 1, %s3427_s16  ;;  %s3431_s17 = sphi %s3466_s17, %s20_s17   ;;  %s3427_s16 = sphi %s3464_s16, %s4688_s16   ;;  %s3423_s15 = sphi %s3462_s15, %s4687_s15   ;;  %s3419_s14 = sphi %s3460_s14, %s4686_s14   ;;  %s3415_s13 = sphi %s3458_s13, %s4685_s13   ;;  %s3411_s12 = sphi %s3456_s12, %s4684_s12  }
   0x7   : > { %p34_p0 = scmp.ge.s32.totalorder %s32_s19, 2  ;;  %s41_s20 = sadd.s32 1, %s3419_s14 }
   0x8   : > { %p48_p1 = scmp.ne.s32.totalorder %s3419_s14, %s3415_s13  ;;  %p49_p2 = scmp.eq.s32.totalorder %s3431_s17, 0 }
   0x9   : > { %s4690_s19 = smov (%p34_p0, %s32_s19), 0  ;;  %p54_p4 = scmp.ne.s32.totalorder %s3415_s13, %s3411_s12 }
   0xa   : > { %p3492_p3 = por %p49_p2, %p48_p1  ;;  %s36_s22 = ssub.s32 %s3427_s16, %s4690_s19 }
   0xb   : > { %p55_p5 = scmp.eq.s32.totalorder %s3061_s18, 0  ;;  %p39_p6 = scmp.eq.s32.totalorder %s36_s22, 0 }
   0xc   : > { %p3264_p8 = scmp.lt.s32.totalorder %s3431_s17, 2  ;;  %s3508_s25 = sand.u32 1, %s3419_s14  }
   0xd   : > { %p3499_p7 = por %p55_p5, %p54_p4  ;;  %s3250_s26 = sshll.u32 %s3427_s16, 7 }
   0xe   : > { %s3505_s24 = scalar_select %p39_p6, %s3419_s14, %s41_s20  }
   0xf   : > { %s3065_s27 = sshll.u32 %s3508_s25, 7  ;;  %s174_s30 = scalar_lea.hbm %s4658_s0, %s3250_s26 }
  0x10   : > { %s175_s4 = sshll.u32 %s174_s30, 4  ;;  %s166_s5 = scalar_lea.vmem [#allocation2], %s3065_s27  ;;  %s176_s4 = int_to_ptr.hbm [resolvable:$true] %s175_s4 }
  0x11   : > { %s177_s6 = sshll.u32 %s166_s5, 4  ;;  %p3517_p9 = pnand %p3264_p8, %p3492_p3  ;;  %s178_s6 = int_to_ptr.vmem [resolvable:$true] %s177_s6 }
  0x12   : > { %p3071_p10 = scmp.ge.s32.totalorder %s3431_s17, 1  ;;  %p210_p11 = scmp.lt.s32.totalorder %s3431_s17, 3 }
  0x13   : > { %s163_s8 = scalar_lea.sflag [#allocation3], %s3508_s25  ;;  %s3433_s9 = smov 128  }
  0x14   : > { %s3434_s10 = smov 8   ;;  %p211_p12 = pnand %p3071_p10, %p210_p11 }
  0x15   : > { %3260 = dma.hbm_to_vmem [thread:$0]  (!%p3517_p9), %s176_s4, 2048, %s178_s6, %s163_s8, %s3433_s9, %s3433_s9, %s3434_s10  }
  0x16   : > { %s3068_s11 = sshll.u32 %s3508_s25, 9  ;;  %s3251_s12 = sshll.u32 %s3427_s16, 9 }
  0x17   : > { %s199_s21 = scalar_lea.hbm %s4659_s1, %s3251_s12  ;;  %s191_s26 = scalar_lea.vmem [#allocation4], %s3068_s11 }
  0x18   : > { %s200_s22 = sshll.u32 %s199_s21, 4  ;;  %s202_s27 = sshll.u32 %s191_s26, 4  ;;  %s201_s22 = int_to_ptr.hbm [resolvable:$true] %s200_s22  ;;  %s203_s27 = int_to_ptr.vmem [resolvable:$true] %s202_s27 }
  0x19   : > { %s188_s28 = scalar_lea.sflag [#allocation5], %s3508_s25  ;;  %214 = sbr.rel (%p211_p12) target bundleno = 486 (0x1e6), region = 28 }
  0x1a   : > { %3263 = dma.hbm_to_vmem [thread:$0]  (!%p3517_p9), %s201_s22, 8192, %s203_s27, %s188_s28, %s3433_s9, %s3433_s9, %s3434_s10  }
  0x1e   : > { %s216_s29 = sand.u32 1, %s3415_s13  }
  0x1f   : > { %s3072_s30 = sshll.u32 %s216_s29, 7  ;;  %s217_s4 = scalar_lea.sflag [#allocation3], %s216_s29 }
  0x20   : > { %s3535_s5 = scalar_lea.vmem [#allocation2], %s3072_s30 }
  0x21   : > { %3402 = dma.done.wait (%p3499_p7), %s217_s4, 2048  }
  0x22   : > { %3404 = vsyncadd (%p3499_p7), %s217_s4, 4294965248  ;;  %s3073_s6 = sshll.u32 %s216_s29, 9  ;;  %s227_s8 = scalar_lea.sflag [#allocation5], %s216_s29 }
  0x23   : > { %s3541_s11 = scalar_lea.vmem [#allocation4], %s3073_s6 }
  0x24   : > { %3406 = dma.done.wait (%p3499_p7), %s227_s8, 8192  }
  0x25   : > { %3408 = vsyncadd (%p3499_p7), %s227_s8, 4294959104  ;;  %v292_v0 = vld [vmem:[%s3535_s5 + $0x28] sm:$0xff]  ;;  %v3080_v1 = vld [vmem:[%s3535_s5 + $0x30] sm:$0xff]  ;;  %s3435_s23 = smov 127   ;;  %vm450_vm0 = vcmask 1041409   ;;  %vm453_vm1 = vcmask 1042434  }
  0x26   : > { %v290_v2 = vld [vmem:[%s3535_s5 + $0x10] sm:$0xff]  ;;  %v317_v3 = vadd.f32 %v3080_v1, %v292_v0  ;;  %v3078_v4 = vld [vmem:[%s3535_s5 + $0x18] sm:$0xff]  ;;  %v288_v5 = vld [vmem:[%s3535_s5] sm:$0xff]  ;;  %vm456_vm2 = vcmask 1043459   ;;  %vm1854_vm3 = vcmask 1044484   ;;  %vm1857_vm4 = vcmask 1045509  }
  0x27   : > { %v3076_v6 = vld [vmem:[%s3535_s5 + $0x8] sm:$0xff]  ;;  %v315_v7 = vadd.f32 %v3078_v4, %v290_v2  ;;  %v3081_v9 = vld [vmem:[%s3535_s5 + $0x38] sm:$0xff]  ;;  %v291_v10 = vld [vmem:[%s3535_s5 + $0x20] sm:$0xff]  ;;  %vm1860_vm5 = vcmask 1046534   ;;  %vm1863_vm6 = vcmask 1047559   ;;  %p272_p13 = scmp.lt.s32.totalorder %s3423_s15, 1 }
  0x28   : > { %v313_v8 = vadd.f32 %v3076_v6, %v288_v5  ;;  %v341_v11 = vrot.slane %v317_v3, 1  ;;  %v318_v12 = vadd.f32 %v3081_v9, %v3080_v1  ;;  %v316_v15 = vadd.f32 %v292_v0, %v291_v10  ;;  %v296_v20 = vld [vmem:[%s3535_s5 + $0x50] sm:$0xff]  ;;  %v3084_v21 = vld [vmem:[%s3535_s5 + $0x58] sm:$0xff]  ;;  %v295_v23 = vld [vmem:[%s3535_s5 + $0x48] sm:$0xff] }
  0x29   : > { %v339_v13 = vrot.slane %v315_v7, 1  ;;  %v314_v16 = vadd.f32 %v3076_v6, %v290_v2  ;;  %v1330_v24 = vld [vmem:[%s3541_s11] sm:$0xff]  ;;  %v3108_v25 = vld [vmem:[%s3541_s11 + $0x8] sm:$0xff]  ;;  %v3132_v28 = vld [vmem:[%s3541_s11 + $0x10] sm:$0xff]  ;;  %v321_v31 = vadd.f32 %v3084_v21, %v296_v20  ;;  %v320_v33 = vadd.f32 %v296_v20, %v295_v23  ;;  %s4692_s15 = smov (!%p272_p13, %s3423_s15), 1 }
  0x2a   : > { %v337_v14 = vrot.slane %v313_v8, 1  ;;  %v3555_v17 = vadd.f32 %v341_v11, %v317_v3  ;;  %v342_v22 = vrot.slane %v318_v12, 1  ;;  %v340_v26 = vrot.slane %v316_v15, 1  ;;  %v3156_v29 = vld [vmem:[%s3541_s11 + $0x18] sm:$0xff]  ;;  %v294_v30 = vld [vmem:[%s3535_s5 + $0x40] sm:$0xff]  ;;  %v299_v42 = vld [vmem:[%s3535_s5 + $0x70] sm:$0xff] }
  0x2b   : > { %v3557_v18 = vadd.f32 %v339_v13, %v315_v7  ;;  %v338_v27 = vrot.slane %v314_v16, 1  ;;  %v1379_v34 = vadd.f32 %v3108_v25, %v1330_v24  ;;  %v1381_v35 = vadd.f32 %v3156_v29, %v3132_v28  ;;  %v3180_v39 = vld [vmem:[%s3541_s11 + $0x20] sm:$0xff]  ;;  %v3087_v43 = vld [vmem:[%s3535_s5 + $0x78] sm:$0xff]  ;;  %v298_v44 = vld [vmem:[%s3535_s5 + $0x68] sm:$0xff]  ;;  %s3252_s25 = smul.u32 168, %s4692_s15 }
  0x2c   : > { %v3559_v19 = vadd.f32 %v337_v14, %v313_v8  ;;  %393 = vrot.lane.b32.xlu2 %v3555_v17, %s3435_s23  ;;  %v3575_v32 = vadd.f32 %v342_v22, %v318_v12  ;;  %v3577_v36 = vadd.f32 %v340_v26, %v316_v15  ;;  %v319_v38 = vadd.f32 %v295_v23, %v294_v30  ;;  %v3204_v47 = vld [vmem:[%s3541_s11 + $0x28] sm:$0xff]  ;;  %v1335_v49 = vld [vmem:[%s3541_s11 + $0x50] sm:$0xff]  ;;  %v3113_v50 = vld [vmem:[%s3541_s11 + $0x58] sm:$0xff] }
  0x2d   : > { %389 = vrot.lane.b32.xlu1 %v3557_v18, %s3435_s23  ;;  %v3579_v37 = vadd.f32 %v338_v27, %v314_v16  ;;  %v1380_v40 = vadd.f32 %v3132_v28, %v3108_v25  ;;  %v345_v41 = vrot.slane %v321_v31, 1  ;;  %v344_v45 = vrot.slane %v320_v33, 1  ;;  %v1333_v53 = vld [vmem:[%s3541_s11 + $0x40] sm:$0xff]  ;;  %v3111_v54 = vld [vmem:[%s3541_s11 + $0x48] sm:$0xff]  ;;  %v3598_v56 = vld [vmem:[%s3541_s11 + $0x90] sm:$0xff]  ;;  %s4547_s10 = scalar_lea.vmem %s4660_s2, %s3252_s25  ;;  %s4596_s20 = scalar_lea.vmem %s4661_s3, %s3252_s25 }
  0x2e   : > { %385 = vrot.lane.b32.xlu0 %v3559_v19, %s3435_s23  ;;  %v1428_v46 = vadd.f32 %v3132_v28, %v1379_v34  ;;  %v1430_v48 = vadd.f32 %v3180_v39, %v1381_v35  ;;  %v343_v51 = vrot.slane %v319_v38, 1  ;;  %v297_v55 = vld [vmem:[%s3535_s5 + $0x60] sm:$0xff]  ;;  %v3601_v57 = vld [vmem:[%s3541_s11 + $0x98] sm:$0xff]  ;;  %v324_v59 = vadd.f32 %v3087_v43, %v299_v42  ;;  %v3182_v5 = vld [vmem:[%s3541_s11 + $0x30] sm:$0xff] }
  0x2f   : > { %v1429_v52 = vadd.f32 %v3156_v29, %v1380_v40  ;;  %v3603_v58 = vadd.f32 %v345_v41, %v321_v31  ;;  %v323_v60 = vadd.f32 %v299_v42, %v298_v44  ;;  %v1384_v61 = vadd.f32 %v3113_v50, %v1335_v49  ;;  %v3137_v1 = vld [vmem:[%s3541_s11 + $0x60] sm:$0xff]  ;;  %v3619_v14 = vld [vmem:[%s3541_s11 + $0x68] sm:$0xff]  ;;  %v3206_v21 = vld [vmem:[%s3541_s11 + $0x38] sm:$0xff] }
  0x30   : > { %v3605_v62 = vadd.f32 %v344_v45, %v320_v33  ;;  %v1477_v63 = vadd.f32 %v3156_v29, %v1428_v46  ;;  %v1479_v0 = vadd.f32 %v3204_v47, %v1430_v48  ;;  %v1382_v2 = vadd.f32 %v3111_v54, %v1333_v53  ;;  %v3614_v8 = vld [vmem:[%s3541_s11 + $0xa0] sm:$0xff]  ;;  %v1337_v16 = vld [vmem:[%s3541_s11 + $0x88] sm:$0xff]  ;;  %v3632_v25 = vld [vmem:[%s3541_s11 + $0xd0] sm:$0xff] }
  0x31   : > { %v3608_v3 = vadd.f32 %v343_v51, %v319_v38  ;;  %v322_v4 = vadd.f32 %v298_v44, %v297_v55  ;;  %v1478_v6 = vadd.f32 %v3180_v39, %v1429_v52  ;;  %v1387_v7 = vadd.f32 %v3601_v57, %v3598_v56  ;;  %v3629_v24 = vld [vmem:[%s3541_s11 + $0xa8] sm:$0xff]  ;;  %v3635_v26 = vld [vmem:[%s3541_s11 + $0xd8] sm:$0xff]  ;;  %v3644_v35 = vld [vmem:[%s3541_s11 + $0x70] sm:$0xff] }
  0x32   : > { %v348_v9 = vrot.slane %v324_v59, 1  ;;  %v1433_v10 = vadd.f32 %v3137_v1, %v1384_v61  ;;  %v347_v11 = vrot.slane %v323_v60, 1  ;;  %v1526_v12 = vadd.f32 %v3180_v39, %v1477_v63  ;;  %v3188_v43 = vld [vmem:[%s3541_s11 + $0xb0] sm:$0xff]  ;;  %v3653_v44 = vld [vmem:[%s3541_s11 + $0xe0] sm:$0xff]  ;;  %v3209_v51 = vld [vmem:[%s3541_s11 + $0x78] sm:$0xff] }
  0x33   : > { %v1528_v13 = vadd.f32 %v3182_v5, %v1479_v0  ;;  %v1431_v15 = vadd.f32 %v1382_v2, %v1335_v49  ;;  %v346_v20 = vrot.slane %v322_v4, 1  ;;  %v1527_v22 = vadd.f32 %v3204_v47, %v1478_v6  ;;  %v1340_v53 = vld [vmem:[%s3541_s11 + $0xc8] sm:$0xff]  ;;  %v3672_v63 = vld [vmem:[%s3541_s11 + $0x110] sm:$0xff]  ;;  %v3675_v0 = vld [vmem:[%s3541_s11 + $0x118] sm:$0xff] }
  0x34   : > { %395 = vrot.lane.b32.xlu2 %v3575_v32, %s3435_s23  ;;  %v1436_v23 = vadd.f32 %v3614_v8, %v1387_v7  ;;  %v3637_v27 = vadd.f32 %v348_v9, %v324_v59  ;;  %v1482_v28 = vadd.f32 %v3619_v14, %v1433_v10  ;;  %v1386_v29 = vadd.f32 %v3598_v56, %v1337_v16  ;;  %v3212_v59 = vld [vmem:[%s3541_s11 + $0xb8] sm:$0xff]  ;;  %v3669_v61 = vld [vmem:[%s3541_s11 + $0xe8] sm:$0xff] }
  0x35   : > { %391 = vrot.lane.b32.xlu1 %v3577_v36, %s3435_s23  ;;  %v1383_v30 = vadd.f32 %v3111_v54, %v1335_v49  ;;  %v3641_v31 = vadd.f32 %v347_v11, %v323_v60  ;;  %v1575_v33 = vadd.f32 %v3204_v47, %v1526_v12  ;;  %v1577_v34 = vadd.f32 %v3206_v21, %v1528_v13  ;;  %v1336_v60 = vld [vmem:[%s3541_s11 + $0x80] sm:$0xff] }
  0x36   : > { %387 = vrot.lane.b32.xlu0 %v3579_v37, %s3435_s23  ;;  %v1480_v38 = vadd.f32 %v3113_v50, %v1431_v15  ;;  %v3646_v39 = vadd.f32 %v346_v20, %v322_v4  ;;  %v1576_v40 = vadd.f32 %v3182_v5, %v1527_v22  ;;  %v1485_v41 = vadd.f32 %v3629_v24, %v1436_v23  ;;  %v3691_v21 = vld [vmem:[%s3541_s11 + $0x120] sm:$0xff] }
  0x37   : > { %v1390_v42 = vadd.f32 %v3635_v26, %v3632_v25  ;;  %v1531_v45 = vadd.f32 %v3644_v35, %v1482_v28  ;;  %v1435_v46 = vadd.f32 %v3601_v57, %v1386_v29  ;;  %v1432_v47 = vadd.f32 %v3113_v50, %v1383_v30 }
  0x38   : > { %v1623_v48 = vrot.slane %v1575_v33, 1  ;;  %v1625_v49 = vrot.slane %v1577_v34, 1  ;;  %v1529_v52 = vadd.f32 %v3137_v1, %v1480_v38  ;;  %v1624_v54 = vrot.slane %v1576_v40, 1 }
  0x39   : > { %v1534_v55 = vadd.f32 %v3188_v43, %v1485_v41  ;;  %v1439_v50 = vadd.f32 %v3653_v44, %v1390_v42  ;;  %v1580_v2 = vadd.f32 %v3209_v51, %v1531_v45  ;;  %v1484_v4 = vadd.f32 %v3614_v8, %v1435_v46  ;;  %v3215_v41 = vld [vmem:[%s3541_s11 + $0xf8] sm:$0xff]  ;;  %v3708_v45 = vld [vmem:[%s3541_s11 + $0x128] sm:$0xff] }
  0x3a   : > { %v1481_v5 = vadd.f32 %v3137_v1, %v1432_v47  ;;  %v1389_v6 = vadd.f32 %v3632_v25, %v1340_v53  ;;  %v3679_v7 = vadd.f32 %v1623_v48, %v1575_v33  ;;  %v3681_v9 = vadd.f32 %v1625_v49, %v1577_v34  ;;  %v3191_v1 = vld [vmem:[%s3541_s11 + $0xf0] sm:$0xff]  ;;  %v1343_v33 = vld [vmem:[%s3541_s11 + $0x108] sm:$0xff]  ;;  %v1339_v34 = vld [vmem:[%s3541_s11 + $0xc0] sm:$0xff] }
  0x3b   : > { %v1578_v10 = vadd.f32 %v3619_v14, %v1529_v52  ;;  %v1385_v11 = vadd.f32 %v1337_v16, %v1336_v60  ;;  %v3684_v12 = vadd.f32 %v1624_v54, %v1576_v40  ;;  %v1583_v13 = vadd.f32 %v3212_v59, %v1534_v55 }
  0x3c   : > { %401 = vrot.lane.b32.xlu2 %v3603_v58, %s3435_s23  ;;  %v1488_v15 = vadd.f32 %v3669_v61, %v1439_v50  ;;  %v1393_v20 = vadd.f32 %v3675_v0, %v3672_v63  ;;  %v1628_v22 = vrot.slane %v1580_v2, 1  ;;  %v1438_v23 = vadd.f32 %v3635_v26, %v1389_v6 }
  0x3d   : > { %399 = vrot.lane.b32.xlu1 %v3605_v62, %s3435_s23  ;;  %v1626_v16 = vrot.slane %v1578_v10, 1  ;;  %v1533_v28 = vadd.f32 %v3629_v24, %v1484_v4  ;;  %v1530_v29 = vadd.f32 %v3619_v14, %v1481_v5  ;;  %v1434_v30 = vadd.f32 %v1385_v11, %v3598_v56  ;;  %v3711_v14 = vld [vmem:[%s3541_s11 + $0x150] sm:$0xff]  ;;  %v3714_v56 = vld [vmem:[%s3541_s11 + $0x158] sm:$0xff]  ;;  %v1342_v11 = vld [vmem:[%s3541_s11 + $0x100] sm:$0xff] }
  0x3e   : > { %397 = vrot.lane.b32.xlu0 %v3608_v3, %s3435_s23  ;;  %v1631_v38 = vrot.slane %v1583_v13, 1  ;;  %v1537_v40 = vadd.f32 %v3191_v1, %v1488_v15  ;;  %v1442_v42 = vadd.f32 %v3691_v21, %v1393_v20  ;;  %v3716_v46 = vadd.f32 %v1628_v22, %v1580_v2  ;;  %v3194_v4 = vld [vmem:[%s3541_s11 + $0x130] sm:$0xff] }
  0x3f   : > { %v1487_v47 = vadd.f32 %v3653_v44, %v1438_v23  ;;  %v1392_v48 = vadd.f32 %v3672_v63, %v1343_v33  ;;  %v1388_v49 = vadd.f32 %v1340_v53, %v1339_v34  ;;  %v3720_v51 = vadd.f32 %v1626_v16, %v1578_v10  ;;  %v3731_v53 = vld [vmem:[%s3541_s11 + $0x160] sm:$0xff]  ;;  %v1346_v10 = vld [vmem:[%s3541_s11 + $0x148] sm:$0xff]  ;;  %v3750_v23 = vld [vmem:[%s3541_s11 + $0x198] sm:$0xff] }
  0x40   : > { %v1582_v52 = vadd.f32 %v3188_v43, %v1533_v28  ;;  %v1579_v54 = vadd.f32 %v3644_v35, %v1530_v29  ;;  %v1483_v55 = vadd.f32 %v3601_v57, %v1434_v30  ;;  %v3724_v59 = vadd.f32 %v1631_v38, %v1583_v13  ;;  %v3754_v16 = vld [vmem:[%s3541_s11 + $0x168] sm:$0xff] }
  0x41   : > { %v1586_v50 = vadd.f32 %v3215_v41, %v1537_v40  ;;  %v1491_v60 = vadd.f32 %v3708_v45, %v1442_v42  ;;  %v1396_v2 = vadd.f32 %v3714_v56, %v3711_v14  ;;  %v1536_v43 = vadd.f32 %v3669_v61, %v1487_v47 }
  0x42   : > { %v1441_v35 = vadd.f32 %v3675_v0, %v1392_v48  ;;  %v1437_v57 = vadd.f32 %v1388_v49, %v3632_v25  ;;  %v1630_v5 = vrot.slane %v1582_v52, 1  ;;  %v1532_v6 = vadd.f32 %v3614_v8, %v1483_v55  ;;  %v3747_v25 = vld [vmem:[%s3541_s11 + $0x190] sm:$0xff]  ;;  %v3218_v8 = vld [vmem:[%s3541_s11 + $0x138] sm:$0xff] }
  0x43   : > { %v1627_v13 = vrot.slane %v1579_v54, 1  ;;  %v1634_v15 = vrot.slane %v1586_v50, 1  ;;  %v1540_v20 = vadd.f32 %v3194_v4, %v1491_v60  ;;  %v1445_v22 = vadd.f32 %v3731_v53, %v1396_v2  ;;  %v3221_v60 = vld [vmem:[%s3541_s11 + $0x178] sm:$0xff] }
  0x44   : > { %407 = vrot.lane.b32.xlu2 %v3637_v27, %s3435_s23  ;;  %v1585_v28 = vadd.f32 %v3191_v1, %v1536_v43  ;;  %v1490_v29 = vadd.f32 %v3691_v21, %v1441_v35  ;;  %v1486_v30 = vadd.f32 %v3635_v26, %v1437_v57  ;;  %v1395_v34 = vadd.f32 %v3711_v14, %v1346_v10  ;;  %v3770_v26 = vld [vmem:[%s3541_s11 + $0x1a0] sm:$0xff] }
  0x45   : > { %405 = vrot.lane.b32.xlu1 %v3641_v31, %s3435_s23  ;;  %v3759_v38 = vadd.f32 %v1630_v5, %v1582_v52  ;;  %v1581_v40 = vadd.f32 %v3629_v24, %v1532_v6  ;;  %v1391_v41 = vadd.f32 %v1343_v33, %v1342_v11  ;;  %v1399_v42 = vadd.f32 %v3750_v23, %v3747_v25  ;;  %v3197_v52 = vld [vmem:[%s3541_s11 + $0x170] sm:$0xff]  ;;  %v1349_v5 = vld [vmem:[%s3541_s11 + $0x188] sm:$0xff]  ;;  %v1345_v6 = vld [vmem:[%s3541_s11 + $0x140] sm:$0xff] }
  0x46   : > { %403 = vrot.lane.b32.xlu0 %v3646_v39, %s3435_s23  ;;  %v3764_v47 = vadd.f32 %v1627_v13, %v1579_v54  ;;  %v3766_v48 = vadd.f32 %v1634_v15, %v1586_v50  ;;  %v1589_v1 = vadd.f32 %v3218_v8, %v1540_v20  ;;  %v1494_v49 = vadd.f32 %v3754_v16, %v1445_v22  ;;  %v3791_v11 = vld [vmem:[%s3541_s11 + $0x1d0] sm:$0xff]  ;;  %v3794_v13 = vld [vmem:[%s3541_s11 + $0x1d8] sm:$0xff] }
  0x47   : > { %v1633_v55 = vrot.slane %v1585_v28, 1  ;;  %v1539_v24 = vadd.f32 %v3708_v45, %v1490_v29  ;;  %v1535_v33 = vadd.f32 %v3653_v44, %v1486_v30  ;;  %v1444_v54 = vadd.f32 %v3714_v56, %v1395_v34  ;;  %v3786_v44 = vld [vmem:[%s3541_s11 + $0x1a8] sm:$0xff] }
  0x48   : > { %v1629_v50 = vrot.slane %v1581_v40, 1  ;;  %v1440_v2 = vadd.f32 %v1391_v41, %v3672_v63  ;;  %v1448_v43 = vadd.f32 %v3770_v26, %v1399_v42  ;;  %v1637_v35 = vrot.slane %v1589_v1, 1 }
  0x49   : > { %v1543_v57 = vadd.f32 %v3197_v52, %v1494_v49  ;;  %v3796_v63 = vadd.f32 %v1633_v55, %v1585_v28  ;;  %v1588_v15 = vadd.f32 %v3194_v4, %v1539_v24  ;;  %v1584_v20 = vadd.f32 %v3669_v61, %v1535_v33  ;;  %v3200_v49 = vld [vmem:[%s3541_s11 + $0x1b0] sm:$0xff]  ;;  %v3811_v4 = vld [vmem:[%s3541_s11 + $0x1e0] sm:$0xff] }
  0x4a   : > { %v1493_v22 = vadd.f32 %v3731_v53, %v1444_v54  ;;  %v3800_v8 = vadd.f32 %v1629_v50, %v1581_v40  ;;  %v1489_v29 = vadd.f32 %v3675_v0, %v1440_v2  ;;  %v1497_v30 = vadd.f32 %v3786_v44, %v1448_v43  ;;  %v3224_v54 = vld [vmem:[%s3541_s11 + $0x1b8] sm:$0xff]  ;;  %v1352_v2 = vld [vmem:[%s3541_s11 + $0x1c8] sm:$0xff] }
  0x4b   : > { %v1398_v34 = vadd.f32 %v3747_v25, %v1349_v5  ;;  %v3805_v41 = vadd.f32 %v1637_v35, %v1589_v1  ;;  %v1592_v42 = vadd.f32 %v3221_v60, %v1543_v57  ;;  %v1394_v28 = vadd.f32 %v1346_v10, %v1345_v6  ;;  %v3179_v43 = vld [vmem:[%s3541_s11 + $0x1e8] sm:$0xff]  ;;  %v1348_v35 = vld [vmem:[%s3541_s11 + $0x180] sm:$0xff] }
  0x4c   : > { %1719 = vrot.lane.b32.xlu2 %v3679_v7, %s3435_s23  ;;  %v1402_v61 = vadd.f32 %v3794_v13, %v3791_v11  ;;  %v1636_v40 = vrot.slane %v1588_v15, 1  ;;  %v1632_v0 = vrot.slane %v1584_v20, 1  ;;  %v1542_v55 = vadd.f32 %v3754_v16, %v1493_v22 }
  0x4d   : > { %1723 = vrot.lane.b32.xlu1 %v3681_v9, %s3435_s23  ;;  %4670 = vst [vmem:[#allocation8_spill] sm:$0xff] %v3805_v41  ;;  %v1538_v1 = vadd.f32 %v3691_v21, %v1489_v29  ;;  %v1546_v24 = vadd.f32 %v3200_v49, %v1497_v30  ;;  %v1447_v10 = vadd.f32 %v3750_v23, %v1398_v34  ;;  %v1640_v33 = vrot.slane %v1592_v42, 1 }
  0x4e   : > { %1721 = vrot.lane.b32.xlu0 %v3684_v12, %s3435_s23  ;;  %v1443_v50 = vadd.f32 %v1394_v28, %v3711_v14  ;;  %v1451_v60 = vadd.f32 %v3811_v4, %v1402_v61  ;;  %v3828_v21 = vadd.f32 %v1636_v40, %v1588_v15  ;;  %v3830_v57 = vadd.f32 %v1632_v0, %v1584_v20  ;;  %v3203_v15 = vld [vmem:[%s3541_s11 + $0x1f0] sm:$0xff] }
  0x4f   : > { %v1591_v6 = vadd.f32 %v3197_v52, %v1542_v55  ;;  %v1587_v22 = vadd.f32 %v3708_v45, %v1538_v1  ;;  %v1595_v29 = vadd.f32 %v3224_v54, %v1546_v24  ;;  %v1496_v30 = vadd.f32 %v3770_v26, %v1447_v10  ;;  %v3227_v55 = vld [vmem:[%s3541_s11 + $0x1f8] sm:$0xff]  ;;  %v1351_v1 = vld [vmem:[%s3541_s11 + $0x1c0] sm:$0xff] }
  0x50   : > { %v1401_v34 = vadd.f32 %v3791_v11, %v1352_v2  ;;  %v1492_v14 = vadd.f32 %v3714_v56, %v1443_v50  ;;  %v1500_v28 = vadd.f32 %v3179_v43, %v1451_v60  ;;  %v1397_v61 = vadd.f32 %v1349_v5, %v1348_v35 }
  0x51   : > { %v1639_v40 = vrot.slane %v1591_v6, 1  ;;  %v1635_v52 = vrot.slane %v1587_v22, 1  ;;  %v1643_v45 = vrot.slane %v1595_v29, 1  ;;  %v1545_v20 = vadd.f32 %v3786_v44, %v1496_v30 }
  0x52   : > { %v1450_v0 = vadd.f32 %v3794_v13, %v1401_v34  ;;  %v1541_v56 = vadd.f32 %v3731_v53, %v1492_v14  ;;  %v1549_v5 = vadd.f32 %v3203_v15, %v1500_v28  ;;  %v1400_v53 = vadd.f32 %v1352_v2, %v1351_v1 }
  0x53   : > { %v3851_v24 = vadd.f32 %v1639_v40, %v1591_v6  ;;  %v3853_v10 = vadd.f32 %v1635_v52, %v1587_v22  ;;  %v1594_v54 = vadd.f32 %v3200_v49, %v1545_v20  ;;  %vm491_vm7 = vcmask 30720  }
  0x54   : > { %1729 = vrot.lane.b32.xlu2 %v3716_v46, %s3435_s23  ;;  %v1499_v50 = vadd.f32 %v3811_v4, %v1450_v0  ;;  %v1590_v60 = vadd.f32 %v3754_v16, %v1541_v56  ;;  %v1598_v35 = vadd.f32 %v3227_v55, %v1549_v5  ;;  %v1449_v16 = vadd.f32 %v1400_v53, %v3791_v11 }
  0x55   : > { %1725 = vrot.lane.b32.xlu1 %v3720_v51, %s3435_s23  ;;  %vm1898_vm8 = vcmask 63488  }
  0x56   : > { %1735 = vrot.lane.b32.xlu0 %v3724_v59, %s3435_s23  ;;  %v1548_v34 = vadd.f32 %v3179_v43, %v1499_v50  ;;  %v1638_v49 = vrot.slane %v1590_v60, 1  ;;  %v1646_v6 = vrot.slane %v1598_v35, 1 }
  0x58   : > { %v3870_v2 = vadd.f32 %v1638_v49, %v1590_v60  ;;  %v3872_v14 = vadd.f32 %v1646_v6, %v1598_v35 }
  0x5a   : > { %4672 = vst [vmem:[#allocation10_spill] sm:$0xff] %v3872_v14 }
  0x5c   : > { %1733 = vrot.lane.b32.xlu2 %v3759_v38, %s3435_s23 }
  0x5d   : > { %1727 = vrot.lane.b32.xlu1 %v3764_v47, %s3435_s23 }
  0x5e   : > { %1741 = vrot.lane.b32.xlu0 %v3766_v48, %s3435_s23 }
  0x64   : > { %1739 = vrot.lane.b32.xlu2 %v3796_v63, %s3435_s23 }
  0x65   : > { %1731 = vrot.lane.b32.xlu1 %v3800_v8, %s3435_s23 }
  0x66   : > { %1747 = vrot.lane.b32.xlu0 %v3805_v41, %s3435_s23  ;;  %v3835_v41 = vadd.f32 %v1640_v33, %v1592_v42  ;;  %v1446_v42 = vadd.f32 %v1397_v61, %v3747_v25  ;;  %v3855_v33 = vadd.f32 %v1643_v45, %v1595_v29  ;;  %v1642_v25 = vrot.slane %v1594_v54, 1 }
  0x67   : > { %v1498_v61 = vadd.f32 %v3794_v13, %v1449_v16 }
  0x68   : > { %4671 = vst [vmem:[#allocation9_spill] sm:$0xff] %v3855_v33  ;;  %v1495_v30 = vadd.f32 %v3750_v23, %v1446_v42  ;;  %v3868_v29 = vadd.f32 %v1642_v25, %v1594_v54  ;;  %v1597_v23 = vadd.f32 %v3203_v15, %v1548_v34 }
  0x69   : > { %v1547_v11 = vadd.f32 %v3811_v4, %v1498_v61 }
  0x6a   : > { %v1544_v22 = vadd.f32 %v3770_v26, %v1495_v30  ;;  %v1645_v40 = vrot.slane %v1597_v23, 1 }
  0x6c   : > { %1745 = vrot.lane.b32.xlu2 %v3828_v21, %s3435_s23  ;;  %v1593_v28 = vadd.f32 %v3786_v44, %v1544_v22  ;;  %v3883_v15 = vadd.f32 %v1645_v40, %v1597_v23  ;;  %v1596_v44 = vadd.f32 %v3179_v43, %v1547_v11 }
  0x6d   : > { %1737 = vrot.lane.b32.xlu1 %v3830_v57, %s3435_s23 }
  0x6e   : > { %1753 = vrot.lane.b32.xlu0 %v3835_v41, %s3435_s23  ;;  %v1641_v26 = vrot.slane %v1593_v28, 1  ;;  %v1644_v13 = vrot.slane %v1596_v44, 1 }
  0x70   : > { %v3885_v52 = vadd.f32 %v1641_v26, %v1593_v28  ;;  %v3891_v20 = vadd.f32 %v1644_v13, %v1596_v44 }
  0x72   : > { %4673 = vst [vmem:[#allocation11_spill] sm:$0xff] %v3885_v52 }
  0x73   : > { %4674 = vst [vmem:[#allocation12_spill] sm:$0xff] %v3891_v20 }
  0x74   : > { %1751 = vrot.lane.b32.xlu2 %v3851_v24, %s3435_s23 }
  0x75   : > { %1743 = vrot.lane.b32.xlu1 %v3853_v10, %s3435_s23 }
  0x76   : > { %1759 = vrot.lane.b32.xlu0 %v3855_v33, %s3435_s23 }
  0x7c   : > { %1757 = vrot.lane.b32.xlu2 %v3868_v29, %s3435_s23 }
  0x7d   : > { %1749 = vrot.lane.b32.xlu1 %v3870_v2, %s3435_s23 }
  0x7e   : > { %1765 = vrot.lane.b32.xlu0 %v3872_v14, %s3435_s23 }
  0x84   : > { %1763 = vrot.lane.b32.xlu2 %v3883_v15, %s3435_s23 }
  0x85   : > { %1755 = vrot.lane.b32.xlu1 %v3885_v52, %s3435_s23 }
  0x86   : > { %v394_v45 = vpop.permute.xlu2 %393 }
  0x87   : > { %v425_v40 = vadd.f32 %v394_v45, %v3555_v17 }
  0x8d   : > { %1761 = vrot.lane.b32.xlu1 %v3891_v20, %s3435_s23 }
  0x8e   : > { %v396_v0 = vpop.permute.xlu2 %395 }
  0x96   : > { %v3895_v4 = vpop.permute.xlu2 %401 }
  0x9e   : > { %v3899_v43 = vpop.permute.xlu2 %407 }
  0x9f   : > { %v3897_v56 = vpop.permute.xlu1 %389 }
  0xa0   : > { %v386_v5 = vpop.permute.xlu0 %385 }
  0xa1   : > { %v421_v35 = vadd.f32 %v386_v5, %v3559_v19 }
  0xa3   : > { %v3908_v25 = vmul.f32 0.125, %v421_v35 }
  0xa5   : > { %v534_v22 = vrot.slane %v3908_v25, 2  ;;  %v493_v44 = vrot.slane %v3908_v25, 1 }
  0xa6   : > { %v3901_v1 = vpop.permute.xlu2 %1719 }
  0xa7   : > { %v392_v42 = vpop.permute.xlu1 %391 }
  0xa8   : > { %v388_v55 = vpop.permute.xlu0 %387  ;;  %v424_v54 = vadd.f32 %v392_v42, %v3577_v36 }
  0xa9   : > { %v422_v28 = vadd.f32 %v388_v55, %v3579_v37 }
  0xaa   : > { %v3906_v53 = vmul.f32 0.125, %v424_v54  ;;  %v426_v54 = vadd.f32 %v396_v0, %v3575_v32 }
  0xac   : > { %v535_v16 = vrot.slane %v3906_v53, 1  ;;  %v449_v36 = vrot.slane %v3906_v53, 7 }
  0xae   : > { %v3915_v23 = vpop.permute.xlu2 %1729  ;;  %v536_v26 = vsel %vm450_vm0, %v535_v16, %v534_v22  ;;  %v451_v11 = vsel %vm450_vm0, %v449_v36, %v3908_v25  ;;  %v576_v22 = vrot.slane %v3906_v53, 2 }
  0xaf   : > { %v400_v50 = vpop.permute.xlu1 %399 }
  0xb0   : > { %v398_v60 = vpop.permute.xlu0 %397 }
  0xb1   : > { %v427_v30 = vadd.f32 %v398_v60, %v3608_v3  ;;  %v3937_v60 = vmul.f32 0.125, %v422_v28 }
  0xb3   : > { %v3910_v34 = vmul.f32 0.125, %v427_v30  ;;  %v616_v30 = vrot.slane %v3908_v25, 4  ;;  %v787_v16 = vrot.slane %v3937_v60, 1 }
  0xb5   : > { %v452_v3 = vrot.slane %v3910_v34, 6  ;;  %v495_v37 = vrot.slane %v3910_v34, 7  ;;  %v537_v17 = vsel %vm453_vm1, %v3910_v34, %v536_v26  ;;  %v578_v28 = vrot.slane %v3910_v34, 1 }
  0xb6   : > { %v3958_v26 = vmul.f32 0.125, %v426_v54 }
  0xb7   : > { %v406_v49 = vpop.permute.xlu1 %405  ;;  %v454_v45 = vsel %vm453_vm1, %v452_v3, %v451_v11  ;;  %v619_v3 = vrot.slane %v3910_v34, 2  ;;  %v3960_v11 = vpop.permute.xlu2 %1733 }
  0xb8   : > { %v404_v6 = vpop.permute.xlu0 %403  ;;  %v431_v42 = vadd.f32 %v406_v49, %v3641_v31  ;;  %v494_v31 = vsel %vm450_vm0, %v3906_v53, %v493_v44  ;;  %v617_v49 = vrot.slane %v3906_v53, 3 }
  0xb9   : > { %v430_v19 = vadd.f32 %v404_v6, %v3646_v39  ;;  %v428_v39 = vadd.f32 %v400_v50, %v3605_v62  ;;  %v575_v6 = vrot.slane %v3908_v25, 3  ;;  %v496_v0 = vsel %vm453_vm1, %v495_v37, %v494_v31 }
  0xba   : > { %v3953_v36 = vmul.f32 0.125, %v431_v42  ;;  %v423_v31 = vadd.f32 %v3897_v56, %v3557_v18  ;;  %v703_v18 = vrot.slane %v3910_v34, 4  ;;  %v910_v56 = vrot.slane %v3937_v60, 4 }
  0xbb   : > { %v3920_v61 = vmul.f32 0.125, %v430_v19  ;;  %v3948_v32 = vmul.f32 0.125, %v428_v39  ;;  %v3963_v39 = vmul.f32 0.125, %v425_v40 }
  0xbd   : > { %v538_v13 = vrot.slane %v3920_v61, 7  ;;  %v455_v5 = vrot.slane %v3920_v61, 5  ;;  %v497_v55 = vrot.slane %v3920_v61, 6  ;;  %v621_v44 = vrot.slane %v3920_v61, 1 }
  0xbe   : > { %v789_v37 = vrot.slane %v3948_v32, 7  ;;  %v872_v52 = vrot.slane %v3948_v32, 1 }
  0xbf   : > { %v539_v62 = vsel %vm456_vm2, %v538_v13, %v537_v17  ;;  %v457_v50 = vsel %vm456_vm2, %v455_v5, %v454_v45  ;;  %v3941_v35 = vpop.permute.xlu1 %1723  ;;  %v498_v19 = vsel %vm456_vm2, %v497_v55, %v496_v0  ;;  %v618_v13 = vsel %vm450_vm0, %v617_v49, %v616_v30 }
  0xc0   : > { %541 = vxpose.xlu2.b32.start.end [1/1] (short) (narrow) %v539_v62, 8  ;;  %459 = vxpose.xlu0.b32.start.end [1/1] (short) (narrow) %v457_v50, 8  ;;  %v577_v5 = vsel %vm450_vm0, %v576_v22, %v575_v6  ;;  %v620_v42 = vsel %vm453_vm1, %v619_v3, %v618_v13  ;;  %v788_v45 = vsel %vm450_vm0, %v3963_v39, %v787_v16  ;;  %v791_v55 = vrot.slane %v3953_v36, 6 }
  0xc1   : > { %v579_v17 = vsel %vm453_vm1, %v578_v28, %v577_v5  ;;  %v622_v54 = vsel %vm456_vm2, %v621_v44, %v620_v42  ;;  %v1040_v62 = vrot.slane %v3958_v26, 7  ;;  %v429_v50 = vadd.f32 %v3895_v4, %v3603_v58  ;;  %v4005_v42 = vpop.permute.xlu2 %1739 }
  0xc2   : > { %500 = vxpose.xlu1.b32.start.end [1/1] (short) (narrow) %v498_v19, 8  ;;  %v580_v40 = vsel %vm456_vm2, %v3920_v61, %v579_v17  ;;  %v700_v49 = vrot.slane %v3908_v25, 6  ;;  %v911_v6 = vrot.slane %v3963_v39, 3  ;;  %v790_v0 = vsel %vm453_vm1, %v789_v37, %v788_v45 }
  0xc3   : > { %v701_v22 = vrot.slane %v3906_v53, 5  ;;  %v658_v16 = vrot.slane %v3908_v25, 5  ;;  %v659_v19 = vrot.slane %v3906_v53, 4  ;;  %v792_v58 = vsel %vm456_vm2, %v791_v55, %v790_v0  ;;  %v4010_v55 = vpop.permute.xlu0 %1721 }
  0xc4   : > { %v661_v4 = vrot.slane %v3910_v34, 3  ;;  %v705_v3 = vrot.slane %v3920_v61, 3  ;;  %v663_v28 = vrot.slane %v3920_v61, 2  ;;  %v1164_v44 = vrot.slane %v3958_v26, 2 }
  0xc5   : > { %v3997_v25 = vmul.f32 0.125, %v429_v50  ;;  %v432_v53 = vadd.f32 %v3899_v43, %v3637_v27  ;;  %v829_v5 = vrot.slane %v3963_v39, 1  ;;  %v4003_v37 = vmul.f32 0.125, %v423_v31 }
  0xc6   : > { %v702_v17 = vsel %vm450_vm0, %v701_v22, %v700_v49  ;;  %v660_v61 = vsel %vm450_vm0, %v659_v19, %v658_v16  ;;  %v913_v45 = vrot.slane %v3948_v32, 2  ;;  %v912_v43 = vsel %vm450_vm0, %v911_v6, %v910_v56 }
  0xc7   : > { %v3981_v30 = vpop.permute.xlu1 %1725  ;;  %v662_v27 = vsel %vm453_vm1, %v661_v4, %v660_v61  ;;  %v828_v49 = vrot.slane %v3937_v60, 2  ;;  %v746_v0 = vrot.slane %v3963_v39, 7  ;;  %v1042_v16 = vrot.slane %v3997_v25, 6 }
  0xc8   : > { %624 = vxpose.xlu2.b32.start.end [1/1] (short) (narrow) %v622_v54, 8  ;;  %582 = vxpose.xlu0.b32.start.end [1/1] (short) (narrow) %v580_v40, 8  ;;  %v704_v54 = vsel %vm453_vm1, %v703_v18, %v702_v17  ;;  %v915_v40 = vrot.slane %v3953_v36, 1  ;;  %v664_v31 = vsel %vm456_vm2, %v663_v28, %v662_v27  ;;  %v953_v19 = vrot.slane %v3963_v39, 4 }
  0xc9   : > { %v706_v50 = vsel %vm456_vm2, %v705_v3, %v704_v54  ;;  %v870_v6 = vrot.slane %v3963_v39, 2  ;;  %v4026_v18 = vmul.f32 0.125, %v432_v53  ;;  %v914_v4 = vsel %vm453_vm1, %v913_v45, %v912_v43  ;;  %v1746_v14 = vpop.permute.xlu2 %1745 }
  0xca   : > { %794 = vxpose.xlu1.b32.start.end [1/1] (short) (narrow) %v792_v58, 8  ;;  %v1166_v58 = vrot.slane %v3997_v25, 1  ;;  %v1041_v56 = vsel %vm450_vm0, %v1040_v62, %v4003_v37  ;;  %v1083_v3 = vrot.slane %v3997_v25, 7  ;;  %v916_v28 = vsel %vm456_vm2, %v915_v40, %v914_v4 }
  0xcb   : > { %v748_v17 = vrot.slane %v3948_v32, 6  ;;  %v1163_v61 = vrot.slane %v4003_v37, 3  ;;  %v1081_v54 = vrot.slane %v4003_v37, 1  ;;  %v830_v27 = vsel %vm450_vm0, %v829_v5, %v828_v49 }
  0xcc   : > { %v832_v53 = vrot.slane %v3953_v36, 7  ;;  %v747_v45 = vsel %vm450_vm0, %v746_v0, %v3937_v60  ;;  %v750_v62 = vrot.slane %v3953_v36, 5  ;;  %v1291_v40 = vrot.slane %v3997_v25, 4 }
  0xcd   : > { %v1791_v4 = vadd.f32 %v3901_v1, %v3679_v7  ;;  %v1043_v5 = vsel %vm453_vm1, %v1042_v16, %v1041_v56  ;;  %v1044_v49 = vrot.slane %v4026_v18, 5  ;;  %v831_v0 = vsel %vm453_vm1, %v3948_v32, %v830_v27  ;;  %v1736_v56 = vpop.permute.xlu0 %1735 }
  0xce   : > { %v749_v43 = vsel %vm453_vm1, %v748_v17, %v747_v45  ;;  %v1165_v34 = vsel %vm450_vm0, %v1164_v44, %v1163_v61  ;;  %v1082_v13 = vsel %vm450_vm0, %v3958_v26, %v1081_v54  ;;  %v833_v33 = vsel %vm456_vm2, %v832_v53, %v831_v0 }
  0xcf   : > { %v4020_v22 = vpop.permute.xlu1 %1727  ;;  %v751_v7 = vsel %vm456_vm2, %v750_v62, %v749_v43  ;;  %v952_v1 = vrot.slane %v3937_v60, 5  ;;  %v869_v16 = vrot.slane %v3937_v60, 3  ;;  %v1085_v17 = vrot.slane %v4026_v18, 6 }
  0xd0   : > { %708 = vxpose.xlu2.b32.start.end [1/1] (short) (narrow) %v706_v50, 8  ;;  %666 = vxpose.xlu0.b32.start.end [1/1] (short) (narrow) %v664_v31, 8  ;;  %v1207_v50 = vrot.slane %v3997_v25, 2  ;;  %v1123_v31 = vrot.slane %v3958_v26, 1  ;;  %v1293_v44 = vrot.slane %v4026_v18, 3  ;;  %v1204_v61 = vrot.slane %v4003_v37, 4 }
  0xd1   : > { %v1167_v27 = vsel %vm453_vm1, %v1166_v58, %v1165_v34  ;;  %v1084_v53 = vsel %vm453_vm1, %v1083_v3, %v1082_v13  ;;  %v4675_v45 = vrot.slane %v3958_v26, 5  ;;  %v1122_v43 = vrot.slane %v4003_v37, 2 }
  0xd2   : > { %918 = vxpose.xlu1.b32.start.end [1/1] (short) (narrow) %v916_v28, 8  ;;  %v1288_v28 = vrot.slane %v4003_v37, 6  ;;  %v1045_v0 = vsel %vm456_vm2, %v1044_v49, %v1043_v5  ;;  %v1796_v54 = vadd.f32 %v3915_v23, %v3716_v46  ;;  %v954_v13 = vsel %vm450_vm0, %v953_v19, %v952_v1 }
  0xd3   : > { %v957_v34 = vrot.slane %v3953_v36, 2  ;;  %v871_v58 = vsel %vm450_vm0, %v870_v6, %v869_v16  ;;  %v1792_v3 = vadd.f32 %v4010_v55, %v3684_v12  ;;  %v1086_v5 = vsel %vm456_vm2, %v1085_v17, %v1084_v53 }
  0xd4   : > { %v1290_v62 = vsel %vm450_vm0, %v4675_v45, %v1288_v28  ;;  %v1798_v46 = vadd.f32 %v3960_v11, %v3759_v38  ;;  %v994_v23 = vrot.slane %v3937_v60, 6  ;;  %v4676_v19 = vrot.slane %v3958_v26, 3 }
  0xd5   : > { %v1292_v49 = vsel %vm453_vm1, %v1291_v40, %v1290_v62  ;;  %v1124_v6 = vsel %vm450_vm0, %v1123_v31, %v1122_v43  ;;  %v873_v55 = vsel %vm453_vm1, %v872_v52, %v871_v58  ;;  %v1246_v1 = vrot.slane %v4003_v37, 5 }
  0xd6   : > { %v1206_v28 = vsel %vm450_vm0, %v4676_v19, %v1204_v61  ;;  %v1247_v16 = vrot.slane %v3958_v26, 4  ;;  %v4099_v40 = vmul.f32 0.041666668, %v1796_v54  ;;  %v1793_v38 = vadd.f32 %v3941_v35, %v3681_v9  ;;  %v1752_v35 = vpop.permute.xlu2 %1751 }
  0xd7   : > { %v4060_v20 = vpop.permute.xlu1 %1731  ;;  %v874_v11 = vsel %vm456_vm2, %v3953_v36, %v873_v55  ;;  %v4106_v17 = vmul.f32 0.041666668, %v1792_v3  ;;  %v1795_v31 = vadd.f32 %v4020_v22, %v3764_v47  ;;  %v1208_v26 = vsel %vm453_vm1, %v1207_v50, %v1206_v28  ;;  %v1742_v22 = vpop.permute.xlu0 %1741 }
  0xd8   : > { %835 = vxpose.xlu2.b32.start.end [1/1] (short) (narrow) %v833_v33, 8  ;;  %753 = vxpose.xlu0.b32.start.end [1/1] (short) (narrow) %v751_v7, 8  ;;  %v4072_v33 = vmul.f32 0.041666668, %v1791_v4  ;;  %v955_v7 = vrot.slane %v3948_v32, 3  ;;  %v1168_v4 = vsel %vm456_vm2, %v4026_v18, %v1167_v27  ;;  %v1126_v37 = vrot.slane %v4026_v18, 7 }
  0xd9   : > { %v4114_v61 = vmul.f32 0.041666668, %v1798_v46  ;;  %v1794_v9 = vadd.f32 %v3981_v30, %v3720_v51  ;;  %v1125_v54 = vsel %vm453_vm1, %v3997_v25, %v1124_v6  ;;  %v1249_v27 = vrot.slane %v3997_v25, 3 }
  0xda   : > { %1047 = vxpose.xlu1.b32.start.end [1/1] (short) (narrow) %v1045_v0, 8  ;;  %v956_v12 = vsel %vm453_vm1, %v955_v7, %v954_v13  ;;  %v1801_v47 = vadd.f32 %v4005_v42, %v3796_v63  ;;  %v4677_v53 = vrot.slane %v3963_v39, 5  ;;  %v997_v45 = vrot.slane %v3948_v32, 4 }
  0xdb   : > { %v958_v60 = vsel %vm456_vm2, %v957_v34, %v956_v12  ;;  %v1248_v62 = vsel %vm450_vm0, %v1247_v16, %v1246_v1  ;;  %v4128_v43 = vmul.f32 0.041666668, %v1793_v38  ;;  %v1804_v51 = vadd.f32 %v1746_v14, %v3828_v21 }
  0xdc   : > { %v996_v50 = vsel %vm450_vm0, %v4677_v53, %v994_v23  ;;  %v999_v30 = vrot.slane %v3953_v36, 3  ;;  %v2553_v25 = vrot.slane %v4099_v40, 7  ;;  %v1799_v63 = vadd.f32 %v1736_v56, %v3724_v59 }
  0xdd   : > { %v4134_v42 = vmul.f32 0.041666668, %v1795_v31  ;;  %v1251_v39 = vrot.slane %v4026_v18, 2  ;;  %v2251_v0 = vrot.slane %v4106_v17, 1  ;;  %v4138_v32 = vmul.f32 0.041666668, %v1794_v9 }
  0xde   : > { %v1294_v7 = vsel %vm456_vm2, %v1293_v44, %v1292_v49  ;;  %v1250_v13 = vsel %vm453_vm1, %v1249_v27, %v1248_v62  ;;  %v1900_v21 = vrot.slane %v4072_v33, 1  ;;  %v4143_v14 = vmul.f32 0.041666668, %v1801_v47  ;;  %v1758_v38 = vpop.permute.xlu2 %1757 }
  0xdf   : > { %v4110_v52 = vpop.permute.xlu1 %1737  ;;  %v998_v36 = vsel %vm453_vm1, %v997_v45, %v996_v50  ;;  %v4678_v59 = vrot.slane %v4026_v18, 1  ;;  %v1127_v34 = vsel %vm456_vm2, %v1126_v37, %v1125_v54  ;;  %v4150_v58 = vmul.f32 0.041666668, %v1804_v51 }
  0xe0   : > { %960 = vxpose.xlu2.b32.start.end [1/1] (short) (narrow) %v958_v60, 8  ;;  %876 = vxpose.xlu0.b32.start.end [1/1] (short) (narrow) %v874_v11, 8  ;;  %v1000_v3 = vsel %vm456_vm2, %v999_v30, %v998_v36  ;;  %v2253_v44 = vrot.slane %v4114_v61, 7  ;;  %v4156_v49 = vmul.f32 0.041666668, %v1799_v63  ;;  %v1807_v46 = vadd.f32 %v1752_v35, %v3851_v24  ;;  %v1748_v35 = vpop.permute.xlu0 %1747 }
  0xe1   : > { %v1210_v56 = vsel %vm456_vm2, %v4678_v59, %v1208_v26  ;;  %v4162_v18 = vsel %vm456_vm2, %v1251_v39, %v1250_v13  ;;  %v2252_v19 = vsel %vm450_vm0, %v4134_v42, %v2251_v0  ;;  %v4168_v28 = vsel %vm450_vm0, %v4138_v32, %v1900_v21  ;;  %v4679_v0 = vld [vmem:[#allocation8_spill] sm:$0xff] }
  0xe2   : > { %1170 = vxpose.xlu1.b32.start.end [1/1] (short) (narrow) %v1168_v4, 8  ;;  %v2554_v4 = vsel %vm450_vm0, %v2553_v25, %v4128_v43  ;;  %v1847_v6 = vrot.slane %v4138_v32, 7  ;;  %v2398_v12 = vrot.slane %v4106_v17, 4  ;;  %v2399_v24 = vrot.slane %v4134_v42, 3 }
  0xe3   : > { %v1949_v55 = vrot.slane %v4072_v33, 2  ;;  %v2047_v1 = vrot.slane %v4072_v33, 4  ;;  %v2255_v16 = vrot.slane %v4143_v14, 6  ;;  %v2048_v60 = vrot.slane %v4138_v32, 3 }
  0xe4   : > { %v1998_v11 = vrot.slane %v4072_v33, 3  ;;  %v1999_v31 = vrot.slane %v4138_v32, 2  ;;  %v2254_v26 = vsel %vm453_vm1, %v2253_v44, %v2252_v19  ;;  %v4181_v37 = vmul.f32 0.041666668, %v1807_v46 }
  0xe5   : > { %v1802_v9 = vadd.f32 %v1742_v22, %v3766_v48  ;;  %v2145_v54 = vrot.slane %v4072_v33, 6  ;;  %v2401_v27 = vrot.slane %v4114_v61, 2  ;;  %v2257_v47 = vrot.slane %v4150_v58, 5 }
  0xe6   : > { %v2146_v53 = vrot.slane %v4138_v32, 5  ;;  %v2096_v50 = vrot.slane %v4072_v33, 5  ;;  %v2400_v45 = vsel %vm450_vm0, %v2399_v24, %v2398_v12  ;;  %v1797_v62 = vadd.f32 %v4060_v20, %v3800_v8 }
  0xe7   : > { %v4159_v23 = vpop.permute.xlu1 %1743  ;;  %v2256_v51 = vsel %vm456_vm2, %v2255_v16, %v2254_v26  ;;  %v2097_v48 = vrot.slane %v4138_v32, 4  ;;  %v1848_v22 = vsel %vm450_vm0, %v1847_v6, %v4072_v33  ;;  %v2403_v25 = vrot.slane %v4143_v14, 1 }
  0xe8   : > { %1088 = vxpose.xlu2.b32.start.end [1/1] (short) (narrow) %v1086_v5, 8  ;;  %1002 = vxpose.xlu0.b32.start.end [1/1] (short) (narrow) %v1000_v3, 8  ;;  %v1950_v5 = vrot.slane %v4138_v32, 1  ;;  %v2555_v63 = vrot.slane %v4156_v49, 6  ;;  %v1810_v39 = vadd.f32 %v1758_v38, %v3868_v29  ;;  %v2259_v8 = vrot.slane %v4181_v37, 4  ;;  %v1754_v38 = vpop.permute.xlu0 %1753 }
  0xe9   : > { %v2402_v20 = vsel %vm453_vm1, %v2401_v27, %v2400_v45  ;;  %v2049_v33 = vsel %vm450_vm0, %v2048_v60, %v2047_v1  ;;  %v2000_v32 = vsel %vm450_vm0, %v1999_v31, %v1998_v11  ;;  %v2258_v21 = vsel %vm1854_vm3, %v2257_v47, %v2256_v51 }
  0xea   : > { %1296 = vxpose.xlu1.b32.start.end [1/1] (short) (narrow) %v1294_v7, 8  ;;  %v1951_v30 = vsel %vm450_vm0, %v1950_v5, %v1949_v55  ;;  %v1805_v7 = vadd.f32 %v1748_v35, %v4679_v0  ;;  %v4206_v36 = vmul.f32 0.041666668, %v1802_v9  ;;  %v1821_v59 = vmul.f32 0.041666668, %v1797_v62  ;;  %v1764_v55 = vpop.permute.xlu2 %1763 }
  0xeb   : > { %v2147_v29 = vsel %vm450_vm0, %v2146_v53, %v2145_v54  ;;  %v2098_v3 = vsel %vm450_vm0, %v2097_v48, %v2096_v50  ;;  %v4213_v44 = vsel %vm453_vm1, %v2555_v63, %v2554_v4  ;;  %v2700_v46 = vrot.slane %v4128_v43, 3 }
  0xec   : > { %v4216_v19 = vmul.f32 0.041666668, %v1810_v39  ;;  %v4218_v6 = vmul.f32 0.041666668, %v1805_v7  ;;  %v2260_v12 = vsel %vm1857_vm4, %v2259_v8, %v2258_v21  ;;  %v2406_v24 = vrot.slane %v4181_v37, 7 }
  0xed   : > { %v1800_v5 = vadd.f32 %v4110_v52, %v3830_v57  ;;  %v2301_v1 = vrot.slane %v4134_v42, 1  ;;  %v2304_v16 = vrot.slane %v4143_v14, 7  ;;  %v2306_v4 = vrot.slane %v4150_v58, 6 }
  0xee   : > { %v1902_v60 = vrot.slane %v1821_v59, 7  ;;  %v2308_v31 = vrot.slane %v4181_v37, 5  ;;  %v1803_v26 = vadd.f32 %v4159_v23, %v3853_v10  ;;  %v1849_v9 = vrot.slane %v1821_v59, 6  ;;  %v4680_v23 = vld [vmem:[#allocation11_spill] sm:$0xff] }
  0xef   : > { %v1750_v13 = vpop.permute.xlu1 %1749  ;;  %v2050_v35 = vrot.slane %v1821_v59, 2  ;;  %v2001_v57 = vrot.slane %v1821_v59, 1  ;;  %v1813_v52 = vadd.f32 %v1764_v55, %v3883_v15  ;;  %v2261_v47 = vrot.slane %v4216_v19, 3 }
  0xf0   : > { %1212 = vxpose.xlu2.b32.start.end [1/1] (short) (narrow) %v1210_v56, 8  ;;  %1129 = vxpose.xlu0.b32.start.end [1/1] (short) (narrow) %v1127_v34, 8  ;;  %v2404_v56 = vsel %vm456_vm2, %v2403_v25, %v2402_v20  ;;  %v2300_v34 = vrot.slane %v4106_v17, 2  ;;  %v1806_v54 = vadd.f32 %v1750_v13, %v3870_v2  ;;  %v2148_v53 = vrot.slane %v1821_v59, 4 }
  0xf1   : > { %v2405_v11 = vsel %vm1854_vm3, %v4150_v58, %v2404_v56  ;;  %v4236_v50 = vmul.f32 0.041666668, %v1800_v5  ;;  %v1808_v45 = vadd.f32 %v1754_v38, %v3835_v41  ;;  %v2099_v62 = vrot.slane %v1821_v59, 3 }
  0xf2   : > { %v2202_v10 = vrot.slane %v4134_v42, 7  ;;  %v1903_v15 = vsel %vm453_vm1, %v1902_v60, %v4168_v28  ;;  %v1952_v2 = vsel %vm453_vm1, %v1821_v59, %v1951_v30  ;;  %v2408_v48 = vrot.slane %v4216_v19, 6  ;;  %v4681_v60 = vld [vmem:[#allocation12_spill] sm:$0xff] }
  0xf3   : > { %v1850_v25 = vsel %vm453_vm1, %v1849_v9, %v1848_v22  ;;  %v2051_v63 = vsel %vm453_vm1, %v2050_v35, %v2049_v33  ;;  %v2002_v41 = vsel %vm453_vm1, %v2001_v57, %v2000_v32  ;;  %v4250_v39 = vmul.f32 0.041666668, %v1813_v52 }
  0xf4   : > { %v4252_v0 = vmul.f32 0.041666668, %v1806_v54  ;;  %v4255_v7 = vsel %vm1860_vm5, %v2261_v47, %v2260_v12  ;;  %v4258_v28 = vsel %vm453_vm1, %v2148_v53, %v2147_v29  ;;  %v4260_v30 = vmul.f32 0.041666668, %v1808_v45  ;;  %v1760_v45 = vpop.permute.xlu0 %1759 }
  0xf5   : > { %v1904_v13 = vrot.slane %v4236_v50, 6  ;;  %v4264_v22 = vsel %vm453_vm1, %v2099_v62, %v2098_v3  ;;  %v2407_v8 = vsel %vm1857_vm4, %v2406_v24, %v2405_v11  ;;  %v1851_v33 = vrot.slane %v4236_v50, 5 }
  0xf6   : > { %v4271_v32 = vsel %vm1860_vm5, %v2408_v48, %v2407_v8  ;;  %v2302_v21 = vsel %vm450_vm0, %v2301_v1, %v2300_v34  ;;  %v1953_v56 = vrot.slane %v4236_v50, 7  ;;  %v2310_v3 = vrot.slane %v4216_v19, 4 }
  0xf7   : > { %v1756_v27 = vpop.permute.xlu1 %1755  ;;  %v1908_v24 = vrot.slane %v4252_v0, 4  ;;  %v1856_v55 = vrot.slane %v4252_v0, 3  ;;  %v2203_v38 = vsel %vm450_vm0, %v2202_v10, %v4106_v17  ;;  %v1905_v1 = vsel %vm456_vm2, %v1904_v13, %v1903_v15 }
  0xf8   : > { %1254 = vxpose.xlu0.b32.start.end [1/1] (short) (narrow) %v4162_v18, 8  ;;  %v1809_v51 = vadd.f32 %v1756_v27, %v4680_v23  ;;  %v4245_v18 = vmul.f32 0.041666668, %v1803_v26  ;;  %v1957_v11 = vrot.slane %v4252_v0, 5  ;;  %v2303_v26 = vsel %vm453_vm1, %v4114_v61, %v2302_v21 }
  0xf9   : > { %v1852_v35 = vsel %vm456_vm2, %v1851_v33, %v1850_v25  ;;  %v1954_v53 = vsel %vm456_vm2, %v1953_v56, %v1952_v2  ;;  %v2263_v21 = vrot.slane %v4250_v39, 2 }
  0xfa   : > { %v4267_v20 = vmul.f32 0.041666668, %v1809_v51  ;;  %v1906_v59 = vrot.slane %v4245_v18, 5  ;;  %v1853_v29 = vrot.slane %v4245_v18, 4  ;;  %v1955_v5 = vrot.slane %v4245_v18, 6 }
  0xfb   : > { %v2052_v51 = vrot.slane %v4236_v50, 1 }
  0xfc   : > { %v1910_v9 = vrot.slane %v4267_v20, 3  ;;  %v1859_v57 = vrot.slane %v4267_v20, 2  ;;  %v1959_v52 = vrot.slane %v4267_v20, 4  ;;  %v1907_v27 = vsel %vm1854_vm3, %v1906_v59, %v1905_v1 }
  0xfd   : > { %v1855_v47 = vsel %vm1854_vm3, %v1853_v29, %v1852_v35  ;;  %v1909_v62 = vsel %vm1857_vm4, %v1908_v24, %v1907_v27  ;;  %v1956_v23 = vsel %vm1854_vm3, %v1955_v5, %v1954_v53  ;;  %v2101_v24 = vrot.slane %v4236_v50, 2  ;;  %v4682_v35 = vld [vmem:[#allocation9_spill] sm:$0xff] }
  0xfe   : > { %v1858_v10 = vsel %vm1857_vm4, %v1856_v55, %v1855_v47  ;;  %v1958_v25 = vsel %vm1857_vm4, %v1957_v11, %v1956_v23  ;;  %v1911_v8 = vsel %vm1860_vm5, %v1910_v9, %v1909_v62  ;;  %v2410_v55 = vrot.slane %v4250_v39, 5 }
  0xff   : > { %v1762_v12 = vpop.permute.xlu1 %1761  ;;  %v1861_v2 = vsel %vm1860_vm5, %v1859_v57, %v1858_v10  ;;  %v1960_v33 = vsel %vm1860_vm5, %v1959_v52, %v1958_v25  ;;  %v2204_v5 = vrot.slane %v4114_v61, 6  ;;  %v2055_v1 = vrot.slane %v4252_v0, 7 }
 0x100   : > { %v1812_v34 = vadd.f32 %v1762_v12, %v4681_v60  ;;  %v2150_v12 = vrot.slane %v4236_v50, 3  ;;  %v2206_v60 = vrot.slane %v4143_v14, 5  ;;  %v2003_v11 = vsel %vm456_vm2, %v4236_v50, %v2002_v41 }
 0x101   : > { %v2004_v9 = vrot.slane %v4245_v18, 7  ;;  %v1811_v57 = vadd.f32 %v1760_v45, %v4682_v35  ;;  %v2057_v52 = vrot.slane %v4267_v20, 6  ;;  %v2006_v27 = vrot.slane %v4252_v0, 6 }
 0x102   : > { %v4292_v54 = vmul.f32 0.041666668, %v1812_v34  ;;  %v2053_v34 = vsel %vm456_vm2, %v2052_v51, %v2051_v63  ;;  %v2305_v47 = vsel %vm456_vm2, %v2304_v16, %v2303_v26  ;;  %v2008_v63 = vrot.slane %v4267_v20, 5  ;;  %v1766_v51 = vpop.permute.xlu0 %1765 }
 0x103   : > { %v2264_v62 = vsel %vm1863_vm6, %v2263_v21, %v4255_v7  ;;  %v2151_v50 = vsel %vm456_vm2, %v2150_v12, %v4258_v28  ;;  %v2054_v41 = vsel %vm1854_vm3, %v4245_v18, %v2053_v34  ;;  %v2102_v10 = vsel %vm456_vm2, %v2101_v24, %v4264_v22 }
 0x104   : > { %v1912_v15 = vrot.slane %v4292_v54, 2  ;;  %v1862_v48 = vrot.slane %v4292_v54, 1  ;;  %v1961_v13 = vrot.slane %v4292_v54, 3  ;;  %v2059_v53 = vrot.slane %v4292_v54, 5 }
 0x105   : > { %v2010_v45 = vrot.slane %v4292_v54, 4  ;;  %v2411_v16 = vsel %vm1863_vm6, %v2410_v55, %v4271_v32  ;;  %v2056_v26 = vsel %vm1857_vm4, %v2055_v1, %v2054_v41  ;;  %v2005_v23 = vsel %vm1854_vm3, %v2004_v9, %v2003_v11 }
 0x106   : > { %v1913_v59 = vsel %vm1863_vm6, %v1912_v15, %v1911_v8  ;;  %v1864_v29 = vsel %vm1863_vm6, %v1862_v48, %v1861_v2  ;;  %v1962_v56 = vsel %vm1863_vm6, %v1961_v13, %v1960_v33  ;;  %v2307_v7 = vsel %vm1854_vm3, %v2306_v4, %v2305_v47 }
 0x107   : > { %1915 = vxpose.xlu2.b32.start.end [1/1] (short) (narrow) %v1913_v59, 8  ;;  %1866 = vxpose.xlu1.b32.start.end [1/1] (short) (narrow) %v1864_v29, 8  ;;  %v2205_v28 = vsel %vm453_vm1, %v2204_v5, %v2203_v38  ;;  %v2058_v15 = vsel %vm1860_vm5, %v2057_v52, %v2056_v26  ;;  %v2007_v48 = vsel %vm1857_vm4, %v2006_v27, %v2005_v23  ;;  %v2447_v22 = vrot.slane %v4106_v17, 5  ;;  %v4683_v59 = vld [vmem:[#allocation10_spill] sm:$0xff] }
 0x108   : > { %1964 = vxpose.xlu0.b32.start.end [1/1] (short) (narrow) %v1962_v56, 8  ;;  %v2448_v25 = vrot.slane %v4134_v42, 4  ;;  %v4351_v32 = vmul.f32 0.041666668, %v1811_v57  ;;  %v2060_v13 = vsel %vm1863_vm6, %v2059_v53, %v2058_v15  ;;  %v2009_v8 = vsel %vm1860_vm5, %v2008_v63, %v2007_v48 }
 0x109   : > { %v2312_v2 = vrot.slane %v4250_v39, 3  ;;  %v2011_v4 = vsel %vm1863_vm6, %v2010_v45, %v2009_v8  ;;  %v2152_v38 = vrot.slane %v4245_v18, 2  ;;  %v2103_v33 = vrot.slane %v4245_v18, 1 }
 0x10a   : > { %v2309_v21 = vsel %vm1857_vm4, %v2308_v31, %v2307_v7  ;;  %v1814_v29 = vadd.f32 %v1766_v51, %v4683_v59  ;;  %v2154_v56 = vrot.slane %v4252_v0, 1  ;;  %v2207_v12 = vsel %vm456_vm2, %v2206_v60, %v2205_v28 }
 0x10b   : > { %v2208_v24 = vrot.slane %v4150_v58, 4  ;;  %v2311_v55 = vsel %vm1860_vm5, %v2310_v3, %v2309_v21  ;;  %v2210_v5 = vrot.slane %v4181_v37, 3  ;;  %v2449_v18 = vsel %vm450_vm0, %v2448_v25, %v2447_v22 }
 0x10c   : > { %v2450_v34 = vrot.slane %v4114_v61, 3  ;;  %v2157_v31 = vrot.slane %v4292_v54, 7  ;;  %v2106_v1 = vrot.slane %v4267_v20, 7  ;;  %v2349_v11 = vrot.slane %v4106_v17, 3 }
 0x10d   : > { %v2350_v60 = vrot.slane %v4134_v42, 2  ;;  %v2153_v9 = vsel %vm1854_vm3, %v2152_v38, %v2151_v50  ;;  %v2104_v35 = vsel %vm1854_vm3, %v2103_v33, %v2102_v10  ;;  %v2108_v3 = vrot.slane %v4292_v54, 6 }
 0x10e   : > { %v2212_v57 = vrot.slane %v4216_v19, 2  ;;  %v4380_v52 = vmul.f32 0.041666668, %v1814_v29  ;;  %v2155_v27 = vsel %vm1857_vm4, %v2154_v56, %v2153_v9  ;;  %v2557_v47 = vrot.slane %v4206_v36, 5 }
 0x10f   : > { %2062 = vxpose.xlu2.b32.start.end [1/1] (short) (narrow) %v2060_v13, 8  ;;  %2266 = vxpose.xlu1.b32.start.end [1/1] (short) (narrow) %v2264_v62, 8  ;;  %v2452_v53 = vrot.slane %v4143_v14, 2  ;;  %v2156_v63 = vsel %vm1860_vm5, %v4267_v20, %v2155_v27  ;;  %v2105_v62 = vsel %vm1857_vm4, %v4252_v0, %v2104_v35  ;;  %v2451_v50 = vsel %vm453_vm1, %v2450_v34, %v2449_v18 }
 0x110   : > { %2013 = vxpose.xlu0.b32.start.end [1/1] (short) (narrow) %v2011_v4, 8  ;;  %v2352_v54 = vrot.slane %v4114_v61, 1  ;;  %v2158_v41 = vsel %vm1863_vm6, %v2157_v31, %v2156_v63  ;;  %v2107_v45 = vsel %vm1860_vm5, %v2106_v1, %v2105_v62  ;;  %v2559_v10 = vrot.slane %v4218_v6, 4 }
 0x111   : > { %v2351_v26 = vsel %vm450_vm0, %v2350_v60, %v2349_v11  ;;  %v2109_v23 = vsel %vm1863_vm6, %v2108_v3, %v2107_v45  ;;  %v2209_v20 = vsel %vm1854_vm3, %v2208_v24, %v2207_v12  ;;  %v2561_v0 = vrot.slane %v4260_v30, 3 }
 0x112   : > { %v2454_v7 = vrot.slane %v4150_v58, 1  ;;  %v2313_v28 = vsel %vm1863_vm6, %v2312_v2, %v2311_v55  ;;  %v2563_v51 = vrot.slane %v4351_v32, 2  ;;  %v2453_v15 = vsel %vm456_vm2, %v2452_v53, %v2451_v50 }
 0x113   : > { %v2701_v48 = vrot.slane %v4099_v40, 2  ;;  %v2214_v22 = vrot.slane %v4250_v39, 1  ;;  %v2565_v25 = vrot.slane %v4380_v52, 1  ;;  %v2353_v13 = vsel %vm453_vm1, %v2352_v54, %v2351_v26 }
 0x114   : > { %v2211_v8 = vsel %vm1857_vm4, %v2210_v5, %v2209_v20  ;;  %v2496_v2 = vrot.slane %v4106_v17, 6  ;;  %v2497_v38 = vrot.slane %v4134_v42, 5  ;;  %v2455_v59 = vsel %vm1854_vm3, %v2454_v7, %v2453_v15 }
 0x115   : > { %v2213_v33 = vsel %vm1860_vm5, %v2212_v57, %v2211_v8  ;;  %v2457_v56 = vrot.slane %v4216_v19, 7  ;;  %v2354_v12 = vsel %vm456_vm2, %v4143_v14, %v2353_v13  ;;  %v2703_v24 = vrot.slane %v4156_v49, 1 }
 0x116   : > { %v2215_v17 = vsel %vm1863_vm6, %v2214_v22, %v2213_v33  ;;  %v2459_v55 = vrot.slane %v4250_v39, 6  ;;  %v2499_v5 = vrot.slane %v4114_v61, 4  ;;  %v2456_v18 = vsel %vm1857_vm4, %v4181_v37, %v2455_v59 }
 0x117   : > { %2160 = vxpose.xlu2.b32.start.end [1/1] (short) (narrow) %v2158_v41, 8  ;;  %2413 = vxpose.xlu1.b32.start.end [1/1] (short) (narrow) %v2411_v16, 8  ;;  %v2558_v16 = vsel %vm456_vm2, %v2557_v47, %v4213_v44  ;;  %v2355_v44 = vrot.slane %v4150_v58, 7  ;;  %v2357_v34 = vrot.slane %v4181_v37, 6  ;;  %v2706_v31 = vrot.slane %v4218_v6, 7 }
 0x118   : > { %2111 = vxpose.xlu0.b32.start.end [1/1] (short) (narrow) %v2109_v23, 8  ;;  %v2560_v4 = vsel %vm1854_vm3, %v2559_v10, %v2558_v16  ;;  %v2498_v1 = vsel %vm450_vm0, %v2497_v38, %v2496_v2  ;;  %v2359_v60 = vrot.slane %v4216_v19, 5  ;;  %v2702_v9 = vsel %vm450_vm0, %v2701_v48, %v2700_v46 }
 0x119   : > { %v2562_v21 = vsel %vm1857_vm4, %v2561_v0, %v2560_v4  ;;  %v2356_v11 = vsel %vm1854_vm3, %v2355_v44, %v2354_v12  ;;  %v2708_v61 = vrot.slane %v4260_v30, 6  ;;  %v2458_v35 = vsel %vm1860_vm5, %v2457_v56, %v2456_v18 }
 0x11a   : > { %v2564_v29 = vsel %vm1860_vm5, %v2563_v51, %v2562_v21  ;;  %v2704_v3 = vsel %vm453_vm1, %v2703_v24, %v2702_v9  ;;  %v2501_v57 = vrot.slane %v4143_v14, 3  ;;  %v2361_v27 = vrot.slane %v4250_v39, 4 }
 0x11b   : > { %v2566_v42 = vsel %vm1863_vm6, %v2565_v25, %v2564_v29  ;;  %v2705_v47 = vsel %vm456_vm2, %v4206_v36, %v2704_v3  ;;  %v2710_v53 = vrot.slane %v4351_v32, 5  ;;  %v2500_v63 = vsel %vm453_vm1, %v2499_v5, %v2498_v1 }
 0x11c   : > { %v2460_v46 = vsel %vm1863_vm6, %v2459_v55, %v2458_v35  ;;  %v2358_v62 = vsel %vm1857_vm4, %v2357_v34, %v2356_v11  ;;  %v2707_v50 = vsel %vm1854_vm3, %v2706_v31, %v2705_v47  ;;  %v2712_v54 = vrot.slane %v4380_v52, 4 }
 0x11d   : > { %v2360_v41 = vsel %vm1860_vm5, %v2359_v60, %v2358_v62  ;;  %v2709_v14 = vsel %vm1857_vm4, %v2708_v61, %v2707_v50  ;;  %v2503_v45 = vrot.slane %v4150_v58, 2  ;;  %v2602_v10 = vrot.slane %v4128_v43, 1 }
 0x11e   : > { %v2502_v26 = vsel %vm456_vm2, %v2501_v57, %v2500_v63  ;;  %v2604_v23 = vrot.slane %v4156_v49, 7  ;;  %v2847_v20 = vrot.slane %v4128_v43, 6  ;;  %v2848_v0 = vrot.slane %v4099_v40, 5 }
 0x11f   : > { %2315 = vxpose.xlu2.b32.start.end [1/1] (short) (narrow) %v2313_v28, 8  ;;  %2568 = vxpose.xlu1.b32.start.end [1/1] (short) (narrow) %v2566_v42, 8  ;;  %v2362_v7 = vsel %vm1863_vm6, %v2361_v27, %v2360_v41  ;;  %v2711_v28 = vsel %vm1860_vm5, %v2710_v53, %v2709_v14  ;;  %v2606_v51 = vrot.slane %v4206_v36, 6  ;;  %v2850_v15 = vrot.slane %v4156_v49, 4 }
 0x120   : > { %2217 = vxpose.xlu0.b32.start.end [1/1] (short) (narrow) %v2215_v17, 8  ;;  %v2713_v58 = vsel %vm1863_vm6, %v2712_v54, %v2711_v28  ;;  %v2505_v48 = vrot.slane %v4181_v37, 1  ;;  %v2608_v22 = vrot.slane %v4218_v6, 5  ;;  %v2852_v16 = vrot.slane %v4206_v36, 3 }
 0x121   : > { %v2504_v25 = vsel %vm1854_vm3, %v2503_v45, %v2502_v26  ;;  %v2603_v13 = vsel %vm450_vm0, %v4099_v40, %v2602_v10  ;;  %v2610_v8 = vrot.slane %v4260_v30, 4  ;;  %v2854_v4 = vrot.slane %v4218_v6, 2 }
 0x122   : > { %v2605_v2 = vsel %vm453_vm1, %v2604_v23, %v2603_v13  ;;  %v2612_v37 = vrot.slane %v4351_v32, 3  ;;  %v2849_v38 = vsel %vm450_vm0, %v2848_v0, %v2847_v20  ;;  %v2856_v33 = vrot.slane %v4260_v30, 1 }
 0x123   : > { %v2607_v21 = vsel %vm456_vm2, %v2606_v51, %v2605_v2  ;;  %v2851_v59 = vsel %vm453_vm1, %v2850_v15, %v2849_v38  ;;  %v2614_v29 = vrot.slane %v4380_v52, 2  ;;  %v2859_v12 = vrot.slane %v4380_v52, 7 }
 0x124   : > { %v2609_v44 = vsel %vm1854_vm3, %v2608_v22, %v2607_v21  ;;  %v2853_v56 = vsel %vm456_vm2, %v2852_v16, %v2851_v59  ;;  %v2506_v24 = vsel %vm1857_vm4, %v2505_v48, %v2504_v25  ;;  %v2508_v17 = vrot.slane %v4250_v39, 7 }
 0x125   : > { %v2611_v42 = vsel %vm1857_vm4, %v2610_v8, %v2609_v44  ;;  %v2855_v55 = vsel %vm1854_vm3, %v2854_v4, %v2853_v56  ;;  %v2749_v34 = vrot.slane %v4128_v43, 4  ;;  %v2750_v31 = vrot.slane %v4099_v40, 3 }
 0x126   : > { %v2613_v5 = vsel %vm1860_vm5, %v2612_v37, %v2611_v42  ;;  %v2857_v18 = vsel %vm1857_vm4, %v2856_v33, %v2855_v55  ;;  %v2651_v11 = vrot.slane %v4128_v43, 2  ;;  %v2652_v60 = vrot.slane %v4099_v40, 1 }
 0x127   : > { %2462 = vxpose.xlu2.b32.start.end [1/1] (short) (narrow) %v2460_v46, 8  ;;  %2715 = vxpose.xlu1.b32.start.end [1/1] (short) (narrow) %v2713_v58, 8  ;;  %v2858_v1 = vsel %vm1860_vm5, %v4351_v32, %v2857_v18  ;;  %v2752_v39 = vrot.slane %v4156_v49, 2  ;;  %v2507_v9 = vsel %vm1860_vm5, %v4216_v19, %v2506_v24  ;;  %v2615_v61 = vsel %vm1863_vm6, %v2614_v29, %v2613_v5 }
 0x128   : > { %2364 = vxpose.xlu0.b32.start.end [1/1] (short) (narrow) %v2362_v7, 8  ;;  %v2860_v35 = vsel %vm1863_vm6, %v2859_v12, %v2858_v1  ;;  %v2754_v3 = vrot.slane %v4206_v36, 1  ;;  %v2509_v57 = vsel %vm1863_vm6, %v2508_v17, %v2507_v9  ;;  %v2655_v27 = vrot.slane %v4206_v36, 7 }
 0x129   : > { %v2657_v47 = vrot.slane %v4218_v6, 6  ;;  %v2751_v53 = vsel %vm450_vm0, %v2750_v31, %v2749_v34  ;;  %v2757_v63 = vrot.slane %v4260_v30, 7  ;;  %v2653_v19 = vsel %vm450_vm0, %v2652_v60, %v2651_v11 }
 0x12a   : > { %v2659_v46 = vrot.slane %v4260_v30, 5  ;;  %v2753_v62 = vsel %vm453_vm1, %v2752_v39, %v2751_v53  ;;  %v2759_v50 = vrot.slane %v4351_v32, 6  ;;  %v2654_v54 = vsel %vm453_vm1, %v4156_v49, %v2653_v19 }
 0x12b   : > { %v2661_v41 = vrot.slane %v4351_v32, 4  ;;  %v2755_v14 = vsel %vm456_vm2, %v2754_v3, %v2753_v62  ;;  %v2761_v45 = vrot.slane %v4380_v52, 5  ;;  %v2656_v10 = vsel %vm456_vm2, %v2655_v27, %v2654_v54 }
 0x12c   : > { %v2663_v26 = vrot.slane %v4380_v52, 3  ;;  %v2756_v23 = vsel %vm1854_vm3, %v4218_v6, %v2755_v14  ;;  %v2658_v20 = vsel %vm1854_vm3, %v2657_v47, %v2656_v10  ;;  %v2798_v51 = vrot.slane %v4128_v43, 5 }
 0x12d   : > { %v2758_v0 = vsel %vm1857_vm4, %v2757_v63, %v2756_v23  ;;  %v2660_v7 = vsel %vm1857_vm4, %v2659_v46, %v2658_v20  ;;  %v2799_v15 = vrot.slane %v4099_v40, 4  ;;  %v2801_v22 = vrot.slane %v4156_v49, 3 }
 0x12e   : > { %v2760_v28 = vsel %vm1860_vm5, %v2759_v50, %v2758_v0  ;;  %v2662_v58 = vsel %vm1860_vm5, %v2661_v41, %v2660_v7  ;;  %v2803_v25 = vrot.slane %v4206_v36, 2  ;;  %v2805_v13 = vrot.slane %v4218_v6, 1 }
 0x12f   : > { %2617 = vxpose.xlu2.b32.start.end [1/1] (short) (narrow) %v2615_v61, 8  ;;  %2862 = vxpose.xlu1.b32.start.end [1/1] (short) (narrow) %v2860_v35, 8  ;;  %v2762_v48 = vsel %vm1863_vm6, %v2761_v45, %v2760_v28  ;;  %v2664_v16 = vsel %vm1863_vm6, %v2663_v26, %v2662_v58  ;;  %v2800_v43 = vsel %vm450_vm0, %v2799_v15, %v2798_v51  ;;  %v2808_v8 = vrot.slane %v4351_v32, 7 }
 0x130   : > { %2511 = vxpose.xlu0.b32.start.end [1/1] (short) (narrow) %v2509_v57, 8  ;;  %v2802_v40 = vsel %vm453_vm1, %v2801_v22, %v2800_v43  ;;  %v2810_v49 = vrot.slane %v4380_v52, 6 }
 0x131   : > { %v2804_v4 = vsel %vm456_vm2, %v2803_v25, %v2802_v40 }
 0x132   : > { %v2806_v2 = vsel %vm1854_vm3, %v2805_v13, %v2804_v4 }
 0x133   : > { %v2807_v37 = vsel %vm1857_vm4, %v4260_v30, %v2806_v2 }
 0x134   : > { %v2809_v36 = vsel %vm1860_vm5, %v2808_v8, %v2807_v37 }
 0x135   : > { %v2811_v38 = vsel %vm1863_vm6, %v2810_v49, %v2809_v36 }
 0x137   : > { %2764 = vxpose.xlu2.b32.start.end [1/1] (short) (narrow) %v2762_v48, 8 }
 0x138   : > { %2666 = vxpose.xlu0.b32.start.end [1/1] (short) (narrow) %v2664_v16, 8 }
 0x140   : > { %2813 = vxpose.xlu0.b32.start.end [1/1] (short) (narrow) %v2811_v38, 8 }
 0x159   : > { %v557_v6 = vpop.trf.xlu2 }
 0x15a   : > { %3089 = vst.msk [vmem:[%s4547_s10 + $0x10] sm:$0x7f] %vm491_vm7, %v557_v6 }
 0x161   : > { %v640_v30 = vpop.trf.xlu2 }
 0x162   : > { %3091 = vst.msk [vmem:[%s4547_s10 + $0x20] sm:$0x7f] %vm491_vm7, %v640_v30 }
 0x164   : > { %v475_v32 = vpop.trf.xlu0 }
 0x165   : > { %492 = vst.msk [vmem:[%s4547_s10] sm:$0x7f] %vm491_vm7, %v475_v32 }
 0x166   : > { %v516_v52 = vpop.trf.xlu1 }
 0x167   : > { %3088 = vst.msk [vmem:[%s4547_s10 + $0x8] sm:$0x7f] %vm491_vm7, %v516_v52 }
 0x169   : > { %v724_v33 = vpop.trf.xlu2 }
 0x16a   : > { %3093 = vst.msk [vmem:[%s4547_s10 + $0x30] sm:$0x7f] %vm491_vm7, %v724_v33 }
 0x16c   : > { %v598_v21 = vpop.trf.xlu0 }
 0x16d   : > { %3090 = vst.msk [vmem:[%s4547_s10 + $0x18] sm:$0x7f] %vm491_vm7, %v598_v21 }
 0x16e   : > { %v810_v59 = vpop.trf.xlu1 }
 0x16f   : > { %3095 = vst.msk [vmem:[%s4547_s10 + $0x40] sm:$0x7f] %vm491_vm7, %v810_v59 }
 0x171   : > { %v851_v44 = vpop.trf.xlu2 }
 0x172   : > { %3096 = vst.msk [vmem:[%s4547_s10 + $0x48] sm:$0x7f] %vm491_vm7, %v851_v44 }
 0x174   : > { %v682_v29 = vpop.trf.xlu0 }
 0x175   : > { %3092 = vst.msk [vmem:[%s4547_s10 + $0x28] sm:$0x7f] %vm491_vm7, %v682_v29 }
 0x176   : > { %v934_v56 = vpop.trf.xlu1 }
 0x177   : > { %3098 = vst.msk [vmem:[%s4547_s10 + $0x58] sm:$0x7f] %vm491_vm7, %v934_v56 }
 0x179   : > { %v976_v12 = vpop.trf.xlu2 }
 0x17a   : > { %3099 = vst.msk [vmem:[%s4547_s10 + $0x60] sm:$0x7f] %vm491_vm7, %v976_v12 }
 0x17c   : > { %v769_v24 = vpop.trf.xlu0 }
 0x17d   : > { %3094 = vst.msk [vmem:[%s4547_s10 + $0x38] sm:$0x7f] %vm491_vm7, %v769_v24 }
 0x17e   : > { %v1063_v17 = vpop.trf.xlu1 }
 0x17f   : > { %3101 = vst.msk [vmem:[%s4547_s10 + $0x70] sm:$0x7f] %vm491_vm7, %v1063_v17 }
 0x181   : > { %v1104_v42 = vpop.trf.xlu2 }
 0x182   : > { %3102 = vst.msk [vmem:[%s4547_s10 + $0x78] sm:$0x7f] %vm491_vm7, %v1104_v42 }
 0x184   : > { %v892_v55 = vpop.trf.xlu0 }
 0x185   : > { %3097 = vst.msk [vmem:[%s4547_s10 + $0x50] sm:$0x7f] %vm491_vm7, %v892_v55 }
 0x186   : > { %v1186_v5 = vpop.trf.xlu1 }
 0x187   : > { %3104 = vst.msk [vmem:[%s4547_s10 + $0x88] sm:$0x7f] %vm491_vm7, %v1186_v5 }
 0x189   : > { %v1228_v18 = vpop.trf.xlu2 }
 0x18a   : > { %3105 = vst.msk [vmem:[%s4547_s10 + $0x90] sm:$0x7f] %vm491_vm7, %v1228_v18 }
 0x18c   : > { %v1018_v34 = vpop.trf.xlu0 }
 0x18d   : > { %3100 = vst.msk [vmem:[%s4547_s10 + $0x68] sm:$0x7f] %vm491_vm7, %v1018_v34 }
 0x18e   : > { %v1312_v31 = vpop.trf.xlu1 }
 0x18f   : > { %3107 = vst.msk [vmem:[%s4547_s10 + $0xa0] sm:$0x7f] %vm491_vm7, %v1312_v31 }
 0x194   : > { %v1145_v1 = vpop.trf.xlu0 }
 0x195   : > { %3103 = vst.msk [vmem:[%s4547_s10 + $0x80] sm:$0x7f] %vm491_vm7, %v1145_v1 }
 0x19c   : > { %v1270_v11 = vpop.trf.xlu0 }
 0x19d   : > { %3106 = vst.msk [vmem:[%s4547_s10 + $0x98] sm:$0x7f] %vm491_vm7, %v1270_v11 }
 0x1a0   : > { %v1931_v60 = vpop.trf.xlu2 }
 0x1a1   : > { %3228 = vst.msk [vmem:[%s4596_s20 + $0x8] sm:$0x7f] %vm1898_vm8, %v1931_v60 }
 0x1a8   : > { %v2078_v39 = vpop.trf.xlu2 }
 0x1a9   : > { %3231 = vst.msk [vmem:[%s4596_s20 + $0x20] sm:$0x7f] %vm1898_vm8, %v2078_v39 }
 0x1ab   : > { %v1882_v9 = vpop.trf.xlu1 }
 0x1ac   : > { %v1980_v61 = vpop.trf.xlu0  ;;  %1899 = vst.msk [vmem:[%s4596_s20] sm:$0x7f] %vm1898_vm8, %v1882_v9 }
 0x1ad   : > { %3229 = vst.msk [vmem:[%s4596_s20 + $0x10] sm:$0x7f] %vm1898_vm8, %v1980_v61 }
 0x1b0   : > { %v2176_v35 = vpop.trf.xlu2 }
 0x1b1   : > { %3233 = vst.msk [vmem:[%s4596_s20 + $0x30] sm:$0x7f] %vm1898_vm8, %v2176_v35 }
 0x1b3   : > { %v2282_v3 = vpop.trf.xlu1 }
 0x1b4   : > { %v2029_v57 = vpop.trf.xlu0  ;;  %3235 = vst.msk [vmem:[%s4596_s20 + $0x40] sm:$0x7f] %vm1898_vm8, %v2282_v3 }
 0x1b5   : > { %3230 = vst.msk [vmem:[%s4596_s20 + $0x18] sm:$0x7f] %vm1898_vm8, %v2029_v57 }
 0x1b8   : > { %v2331_v27 = vpop.trf.xlu2 }
 0x1b9   : > { %3236 = vst.msk [vmem:[%s4596_s20 + $0x48] sm:$0x7f] %vm1898_vm8, %v2331_v27 }
 0x1bb   : > { %v2429_v47 = vpop.trf.xlu1 }
 0x1bc   : > { %v2127_v53 = vpop.trf.xlu0  ;;  %3238 = vst.msk [vmem:[%s4596_s20 + $0x58] sm:$0x7f] %vm1898_vm8, %v2429_v47 }
 0x1bd   : > { %3232 = vst.msk [vmem:[%s4596_s20 + $0x28] sm:$0x7f] %vm1898_vm8, %v2127_v53 }
 0x1c0   : > { %v2478_v63 = vpop.trf.xlu2 }
 0x1c1   : > { %3239 = vst.msk [vmem:[%s4596_s20 + $0x60] sm:$0x7f] %vm1898_vm8, %v2478_v63 }
 0x1c3   : > { %v2584_v19 = vpop.trf.xlu1 }
 0x1c4   : > { %v2233_v46 = vpop.trf.xlu0  ;;  %3241 = vst.msk [vmem:[%s4596_s20 + $0x70] sm:$0x7f] %vm1898_vm8, %v2584_v19 }
 0x1c5   : > { %3234 = vst.msk [vmem:[%s4596_s20 + $0x38] sm:$0x7f] %vm1898_vm8, %v2233_v46 }
 0x1c8   : > { %v2633_v62 = vpop.trf.xlu2 }
 0x1c9   : > { %3242 = vst.msk [vmem:[%s4596_s20 + $0x78] sm:$0x7f] %vm1898_vm8, %v2633_v62 }
 0x1cb   : > { %v2731_v50 = vpop.trf.xlu1 }
 0x1cc   : > { %v2380_v54 = vpop.trf.xlu0  ;;  %3244 = vst.msk [vmem:[%s4596_s20 + $0x88] sm:$0x7f] %vm1898_vm8, %v2731_v50 }
 0x1cd   : > { %3237 = vst.msk [vmem:[%s4596_s20 + $0x50] sm:$0x7f] %vm1898_vm8, %v2380_v54 }
 0x1d0   : > { %v2780_v41 = vpop.trf.xlu2 }
 0x1d1   : > { %3245 = vst.msk [vmem:[%s4596_s20 + $0x90] sm:$0x7f] %vm1898_vm8, %v2780_v41 }
 0x1d3   : > { %v2878_v14 = vpop.trf.xlu1 }
 0x1d4   : > { %v2527_v45 = vpop.trf.xlu0  ;;  %3247 = vst.msk [vmem:[%s4596_s20 + $0xa0] sm:$0x7f] %vm1898_vm8, %v2878_v14 }
 0x1d5   : > { %3240 = vst.msk [vmem:[%s4596_s20 + $0x68] sm:$0x7f] %vm1898_vm8, %v2527_v45 }
 0x1dc   : > { %v2682_v10 = vpop.trf.xlu0 }
 0x1dd   : > { %3243 = vst.msk [vmem:[%s4596_s20 + $0x80] sm:$0x7f] %vm1898_vm8, %v2682_v10 }
 0x1e4   : > { %v2829_v26 = vpop.trf.xlu0 }
 0x1e5   : > { %3246 = vst.msk [vmem:[%s4596_s20 + $0x98] sm:$0x7f] %vm1898_vm8, %v2829_v26 }
 0x1e6 PF: > { %s20_s17 = sadd.s32 1, %s3431_s17   ;;  %s4684_s12 = smov %s3415_s13 }
 0x1e7   : > { %p17_p0 = scmp.ge.s32.totalorder %s20_s17, 4   ;;  %s4685_s13 = smov %s3419_s14 }
 0x1e8   : > { %s4686_s14 = smov %s3505_s24  ;;  %s4687_s15 = smov %s3427_s16 }
 0x1e9   : > { %s4688_s16 = smov %s4690_s19  ;;  %19 = sbr.rel (!%p17_p0) target bundleno = 6 (0x6), region = 139 }
 0x1ee   :  { %2945 = vsyncpa [#allocation3], 1 }
 0x1ef   :  { %2947 = vsyncpa [#allocation3 + $0x1], 1 }
 0x1f0   :  { %2948 = vsyncpa [#allocation5], 1 }
 0x1f1   :  { %2950 = vsyncpa [#allocation5 + $0x1], 1 }

</bundles_post_ra>
